<compile_context>
chip_gen: v6e
topology: v6e:2x2x1
jax: 0.10.0
libtpu: 0.0.40
codegen_flags: <defaults>
</compile_context>

<pallas_src>
import jax
import jax.numpy as jnp
from jax.experimental import pallas as pl
from jax.experimental.pallas import tpu as pltpu

# ----------------------------- tiny config ----------------------------------
# Scaled-down, lane-aligned stand-in for xlm-roberta-base
# (hidden 768 -> 128, 12 layers -> 2, 12 heads -> 4, intermediate 3072 -> 256,
#  cls projection 768 -> 128).
VOCAB          = 100
HIDDEN         = 128
N_HEADS        = 4
HEAD_DIM       = HIDDEN // N_HEADS
INTER          = 256
N_LAYERS       = 2
MAX_POS        = 40
TYPE_VOCAB     = 1
CLS_DIM        = 128          # stands in for the 768-wide self.cls projection
NUM_LABELS     = 3            # negative / neutral / positive
NUM_LABELS_PAD = 128          # lane-dense padded logits width (sliced to 3 outside)
LN_EPS         = 1e-5
PAD_IDX        = 1


# --------------------------- in-kernel helpers -------------------------------
def _layer_norm(x, g, b, eps=LN_EPS):
    """f32 layernorm over the lane (feature) axis."""
    mu = jnp.mean(x, axis=-1, keepdims=True)
    var = jnp.mean(jnp.square(x - mu), axis=-1, keepdims=True)
    return (x - mu) * jax.lax.rsqrt(var + eps) * g + b


def _erf_approx(x):
    # Abramowitz & Stegun 7.1.26 (max abs err ~1.5e-7); VPU + EUP (exp, rcp) ops.
    a1, a2, a3, a4, a5 = 0.254829592, -0.284496736, 1.421413741, -1.453152027, 1.061405429
    p = 0.3275911
    sign = jnp.where(x < 0.0, -1.0, 1.0)
    ax = jnp.abs(x)
    t = pl.reciprocal(1.0 + p * ax, approx=True)        # EUP slot instead of VALU divide
    poly = ((((a5 * t + a4) * t + a3) * t + a2) * t + a1) * t
    return sign * (1.0 - poly * jnp.exp(-ax * ax))


def _gelu_erf(x):
    # erf-GELU for parity with HF xlm-roberta (not the tanh approximation).
    # TODO(synk): exact lax.erf not used in-kernel; A&S approximation (~1.5e-7 abs err).
    return 0.5 * x * (1.0 + _erf_approx(x * 0.7071067811865476))


# ------------------------ fused encoder + head kernel ------------------------
def _encoder_kernel(
    x_in_ref, mask_ref, emb_ln_ref,
    wqkv_ref, wo_ref, wi_ref, wf_ref, small_ref,
    cls_w_ref, cls_bias_ref, cls2_w_ref,
    logits_ref, x_ref):
    """One grid step == one transformer layer; x_ref is the persistent VMEM carry.
    Layer 0 also applies the embedding LayerNorm; the last layer also runs the
    classification head and writes the (lane-padded) logits output."""
    l = pl.program_id(0)
    batch, seq = mask_ref.shape
    scale = 1.0 / (HEAD_DIM ** 0.5)

    # Embedding layernorm folded into layer 0 (no extra launch).
    @pl.when(l == 0)
    def _embed_ln():
        x_ref[...] = _layer_norm(x_in_ref[...], emb_ln_ref[0:1, :], emb_ln_ref[1:2, :])

    # --- unpack the single packed per-layer small-params block (one DMA) ---
    small = small_ref[...]                      # [8, 3H] f32
    bqkv  = small[0:1, :]
    bo    = small[1:2, :HIDDEN]
    bi    = small[2:3, :INTER]
    bf    = small[3:4, :HIDDEN]
    ln1_g = small[4:5, :HIDDEN]
    ln1_b = small[5:6, :HIDDEN]
    ln2_g = small[6:7, :HIDDEN]
    ln2_b = small[7:8, :HIDDEN]

    x = x_ref[...]                              # [M, H] f32 carry (VMEM-resident)
    x_b = x.astype(jnp.bfloat16)                # bf16 MXU input

    # ---- fused QKV projection: one [H, 3H] matmul, f32 accumulate ----
    qkv = jnp.dot(x_b, wqkv_ref[...],
                  preferred_element_type=jnp.float32) + bqkv            # [M, 3H] f32

    # ---- attention: scale folded into q, mask broadcast hoisted ----
    mask_b = mask_ref[...][:, None, :]          # [B, 1, S] additive mask, f32
    q_all = qkv[:, :HIDDEN] * scale             # fold 1/sqrt(d) once per layer
    k_all = qkv[:, HIDDEN:2 * HIDDEN]
    v_all = qkv[:, 2 * HIDDEN:3 * HIDDEN]

    ctx_parts = []
    for h in range(N_HEADS):                    # statically unrolled (tiny)
        lo = h * HEAD_DIM
        q3 = q_all[:, lo:lo + HEAD_DIM].reshape(batch, seq, HEAD_DIM).astype(jnp.bfloat16)
        k3 = k_all[:, lo:lo + HEAD_DIM].reshape(batch, seq, HEAD_DIM).astype(jnp.bfloat16)
        v3 = v_all[:, lo:lo + HEAD_DIM].reshape(batch, seq, HEAD_DIM).astype(jnp.bfloat16)

        s = jnp.einsum("bqd,bkd->bqk", q3, k3,
                       preferred_element_type=jnp.float32)               # [B, S, S] f32
        s = s + mask_b
        s = s - jnp.max(s, axis=-1, keepdims=True)
        p = jnp.exp(s)
        p = p * pl.reciprocal(jnp.sum(p, axis=-1, keepdims=True), approx=True)  # EUP
        # TODO(synk): attention dropout (p=0.1) is identity in eval mode.

        c = jnp.einsum("bqk,bkd->bqd", p.astype(jnp.bfloat16), v3,
                       preferred_element_type=jnp.float32)               # [B, S, HD] f32
        ctx_parts.append(c.reshape(batch * seq, HEAD_DIM))

    # Merge heads in-register (full 128-lane value; no masked partial stores).
    ctx = jnp.concatenate(ctx_parts, axis=-1).astype(jnp.bfloat16)       # [M, H] bf16

    # ---- o-proj + residual + LN1 ----
    attn = jnp.dot(ctx, wo_ref[...], preferred_element_type=jnp.float32) + bo
    # TODO(synk): hidden dropout (p=0.1) after o-proj / FFN is identity in eval mode.
    x1 = _layer_norm(attn + x, ln1_g, ln1_b)

    # ---- FFN: wi + erf-GELU + wf + residual + LN2 ----
    inter = jnp.dot(x1.astype(jnp.bfloat16), wi_ref[...],
                    preferred_element_type=jnp.float32) + bi
    inter = _gelu_erf(inter)
    ffn = jnp.dot(inter.astype(jnp.bfloat16), wf_ref[...],
                  preferred_element_type=jnp.float32) + bf
    x2 = _layer_norm(ffn + x1, ln2_g, ln2_b)
    x_ref[...] = x2                              # persistent carry for next layer

    # ---- fused classification head on the last layer only ----
    @pl.when(l == N_LAYERS - 1)
    def _cls_head():
        cls_tok = x2.reshape(batch, seq, HIDDEN)[:, 0, :]                # [B, H] CLS rows
        h1 = jnp.dot(cls_tok.astype(jnp.bfloat16), cls_w_ref[...],
                     preferred_element_type=jnp.float32) + cls_bias_ref[0:1, :]
        # TODO(synk): nn.Dropout(p=0.1) between cls and cls2 is identity in eval mode.
        logits = jnp.dot(h1.astype(jnp.bfloat16), cls2_w_ref[...],
                         preferred_element_type=jnp.float32) + cls_bias_ref[1:2, :]
        logits_ref[...] = logits                 # lane-dense padded (B, 128) store


def encoder_and_head_forward(x_emb, ext_mask, params):
    """Single pallas_call: embedding LN + all layers + classification head."""
    M = x_emb.shape[0]
    B, S = ext_mask.shape

    flops_layer = (2 * M * HIDDEN * 3 * HIDDEN             # fused QKV
                   + 4 * B * N_HEADS * S * S * HEAD_DIM     # scores + context
                   + 2 * M * HIDDEN * HIDDEN                # o-proj
                   + 4 * M * HIDDEN * INTER)                # FFN
    flops_head = 2 * B * HIDDEN * CLS_DIM + 2 * B * CLS_DIM * NUM_LABELS_PAD
    trans_layer = B * N_HEADS * S * S + M * INTER
    weight_bytes = (N_LAYERS * 2 * (3 * HIDDEN * HIDDEN + HIDDEN * HIDDEN
                                    + 2 * HIDDEN * INTER)            # bf16 weights
                    + N_LAYERS * 8 * 3 * HIDDEN * 4                  # packed f32 small params
                    + 2 * (HIDDEN * CLS_DIM + CLS_DIM * NUM_LABELS_PAD))
    cost = pl.CostEstimate(flops=N_LAYERS * flops_layer + flops_head,
                           transcendentals=N_LAYERS * trans_layer,
                           bytes_accessed=weight_bytes + M * HIDDEN * 4
                           + B * NUM_LABELS_PAD * 4)

    grid_spec = pltpu.PrefetchScalarGridSpec(
        num_scalar_prefetch=0,
        grid=(N_LAYERS,),
        in_specs=[
            pl.BlockSpec((M, HIDDEN), lambda l: (0, 0)),                    # embeddings
            pl.BlockSpec((B, S), lambda l: (0, 0)),                         # additive mask
            pl.BlockSpec((2, HIDDEN), lambda l: (0, 0)),                    # emb LN [g; b]
            pl.BlockSpec((None, HIDDEN, 3 * HIDDEN), lambda l: (l, 0, 0)),  # wqkv (stacked)
            pl.BlockSpec((None, HIDDEN, HIDDEN), lambda l: (l, 0, 0)),      # wo
            pl.BlockSpec((None, HIDDEN, INTER), lambda l: (l, 0, 0)),       # wi
            pl.BlockSpec((None, INTER, HIDDEN), lambda l: (l, 0, 0)),       # wf
            pl.BlockSpec((None, 8, 3 * HIDDEN), lambda l: (l, 0, 0)),       # packed biases/LN
            pl.BlockSpec((HIDDEN, CLS_DIM), lambda l: (0, 0)),              # cls weight
            pl.BlockSpec((2, CLS_DIM), lambda l: (0, 0)),                   # [cls_b; cls2_b]
            pl.BlockSpec((CLS_DIM, NUM_LABELS_PAD), lambda l: (0, 0)),      # cls2 weight (padded)
        ],
        # Same block index every step -> logits buffer resident, written on last step.
        out_specs=pl.BlockSpec((B, NUM_LABELS_PAD), lambda l: (0, 0)),
        scratch_shapes=[pltpu.VMEM((M, HIDDEN), jnp.float32)],              # activation carry
    )

    return pl.pallas_call(
        _encoder_kernel,
        out_shape=jax.ShapeDtypeStruct((B, NUM_LABELS_PAD), jnp.float32),
        grid_spec=grid_spec,
        compiler_params=pltpu.CompilerParams(
            dimension_semantics=("arbitrary",),            # sequential layer dependency
            vmem_limit_bytes=8 * 1024 * 1024),             # real working set << 8 MiB
        cost_estimate=cost,
    )(x_emb, ext_mask, params["emb_ln"],
      params["wqkv"], params["wo"], params["wi"], params["wf"], params["small"],
      params["cls_w"], params["cls_bias"], params["cls2_w"])


# ----------------------------- parameters ------------------------------------
def init_params(key):
    keys = iter(jax.random.split(key, 16))

    def w(shape, dtype=jnp.bfloat16, scale=0.02):
        return (scale * jax.random.normal(next(keys), shape, jnp.float32)).astype(dtype)

    params = dict(
        word_emb=w((VOCAB, HIDDEN), dtype=jnp.float32),
        pos_emb=w((MAX_POS, HIDDEN), dtype=jnp.float32),
        type_emb=w((TYPE_VOCAB, HIDDEN), dtype=jnp.float32),
        # packed [gamma; beta] for the embedding LayerNorm
        emb_ln=jnp.concatenate([jnp.ones((1, HIDDEN), jnp.float32),
                                jnp.zeros((1, HIDDEN), jnp.float32)], axis=0),
        cls_w=w((HIDDEN, CLS_DIM)),
    )
    # cls2 padded to a lane-dense 128-wide output; only the first NUM_LABELS
    # columns are real weights, the rest are zeros and sliced off outside.
    cls2_real = 0.02 * jax.random.normal(next(keys), (CLS_DIM, NUM_LABELS), jnp.float32)
    params["cls2_w"] = (jnp.zeros((CLS_DIM, NUM_LABELS_PAD), jnp.float32)
                        .at[:, :NUM_LABELS].set(cls2_real).astype(jnp.bfloat16))
    # packed head biases: row 0 = cls bias, row 1 = cls2 bias (both zero-init)
    params["cls_bias"] = jnp.zeros((2, CLS_DIM), jnp.float32)

    def stack(make):
        return jnp.stack([make() for _ in range(N_LAYERS)])

    params["wqkv"] = stack(lambda: w((HIDDEN, 3 * HIDDEN)))      # fused q|k|v weights
    params["wo"] = stack(lambda: w((HIDDEN, HIDDEN)))
    params["wi"] = stack(lambda: w((HIDDEN, INTER)))
    params["wf"] = stack(lambda: w((INTER, HIDDEN)))

    # All small per-layer f32 params packed into ONE (N_LAYERS, 8, 3H) tensor:
    # row 0: bqkv | 1: bo | 2: bi | 3: bf | 4: ln1_g | 5: ln1_b | 6: ln2_g | 7: ln2_b
    small = jnp.zeros((N_LAYERS, 8, 3 * HIDDEN), jnp.float32)
    small = small.at[:, 4, :HIDDEN].set(1.0)     # ln1 gamma = 1
    small = small.at[:, 6, :HIDDEN].set(1.0)     # ln2 gamma = 1
    params["small"] = small
    return params


# ----------------------------- forward pass -----------------------------------
def xlmr_forward(params, input_ids, attention_mask, token_type_ids):
    B, S = input_ids.shape

    # --- embeddings (gather glue in plain JAX) ---
    mask_i = attention_mask.astype(jnp.int32)
    position_ids = jnp.cumsum(mask_i, axis=1) * mask_i + PAD_IDX    # roberta-style positions
    emb = (params["word_emb"][input_ids]
           + params["pos_emb"][position_ids]
           + params["type_emb"][token_type_ids])
    x_emb = emb.reshape(B * S, HIDDEN).astype(jnp.float32)
    # TODO(synk): embedding dropout (p=0.1) is identity in eval mode.

    # additive padding mask, kept in f32 (never cast to bf16)
    ext_mask = (1.0 - attention_mask.astype(jnp.float32)) * -1e9    # [B, S]

    # --- one fused launch: embedding LN + all layers + classification head ---
    logits_pad = encoder_and_head_forward(x_emb, ext_mask, params)
    return logits_pad[:, :NUM_LABELS]


# ----------------------------- main -------------------------------------------
if __name__ == "__main__":
    key = jax.random.PRNGKey(0)
    pkey, ikey = jax.random.split(key)

    params = init_params(pkey)

    B, S = 2, 8
    input_ids = jax.random.randint(ikey, (B, S), minval=3, maxval=VOCAB, dtype=jnp.int32)
    # first sequence full length, second has 2 padded positions
    attention_mask = jnp.array([[1] * S, [1] * (S - 2) + [0, 0]], dtype=jnp.int32)
    input_ids = jnp.where(attention_mask == 1, input_ids, PAD_IDX)
    token_type_ids = jnp.zeros((B, S), dtype=jnp.int32)

    forward = jax.jit(xlmr_forward)
    logits = forward(params, input_ids, attention_mask, token_type_ids)
    logits = jax.block_until_ready(logits)

    assert logits.shape == (B, NUM_LABELS)
    assert bool(jnp.all(jnp.isfinite(logits)))
    print("KERNEL_OK")
</pallas_src>

<mosaic_0001>
module attributes {stable_mosaic.version = 11 : i64} {
  func.func @_encoder_kernel(%arg0: i32, %arg1: memref<16x128xf32, #tpu.memory_space<vmem>>, %arg2: memref<2x8xf32, #tpu.memory_space<vmem>>, %arg3: memref<2x128xf32, #tpu.memory_space<vmem>>, %arg4: memref<1x128x384xbf16, #tpu.memory_space<vmem>>, %arg5: memref<1x128x128xbf16, #tpu.memory_space<vmem>>, %arg6: memref<1x128x256xbf16, #tpu.memory_space<vmem>>, %arg7: memref<1x256x128xbf16, #tpu.memory_space<vmem>>, %arg8: memref<1x8x384xf32, #tpu.memory_space<vmem>>, %arg9: memref<128x128xbf16, #tpu.memory_space<vmem>>, %arg10: memref<2x128xf32, #tpu.memory_space<vmem>>, %arg11: memref<128x128xbf16, #tpu.memory_space<vmem>>, %arg12: memref<2x128xf32, #tpu.memory_space<vmem>>, %arg13: memref<16x128xf32, #tpu.memory_space<vmem>>) attributes {dimension_semantics = [#tpu.dimension_semantics<arbitrary>], iteration_bounds = array<i64: 2>, scalar_prefetch = 0 : i64, scratch_operands = 1 : i64, tpu.core_type = #tpu.core_type<tc>, window_params = [{pipeline_mode = #tpu.pipeline_mode<synchronous>, transform_indices = @transform_0, window_bounds = array<i64: 16, 128>}, {pipeline_mode = #tpu.pipeline_mode<synchronous>, transform_indices = @transform_1, window_bounds = array<i64: 2, 8>}, {pipeline_mode = #tpu.pipeline_mode<synchronous>, transform_indices = @transform_2, window_bounds = array<i64: 2, 128>}, {transform_indices = @transform_3, window_bounds = array<i64: 1, 128, 384>}, {transform_indices = @transform_4, window_bounds = array<i64: 1, 128, 128>}, {transform_indices = @transform_5, window_bounds = array<i64: 1, 128, 256>}, {transform_indices = @transform_6, window_bounds = array<i64: 1, 256, 128>}, {transform_indices = @transform_7, window_bounds = array<i64: 1, 8, 384>}, {pipeline_mode = #tpu.pipeline_mode<synchronous>, transform_indices = @transform_8, window_bounds = array<i64: 128, 128>}, {pipeline_mode = #tpu.pipeline_mode<synchronous>, transform_indices = @transform_9, window_bounds = array<i64: 2, 128>}, {pipeline_mode = #tpu.pipeline_mode<synchronous>, transform_indices = @transform_10, window_bounds = array<i64: 128, 128>}, {pipeline_mode = #tpu.pipeline_mode<synchronous>, transform_indices = @transform_11, window_bounds = array<i64: 2, 128>}]} {
    %c0_i32 = arith.constant 0 : i32
    %0 = arith.cmpi eq, %arg0, %c0_i32 : i32
    %1 = arith.extui %0 : i1 to i32
    %c0_i32_0 = arith.constant 0 : i32
    %2 = arith.cmpi ne, %1, %c0_i32_0 : i32
    scf.if %2 {
      %c0_67 = arith.constant 0 : index
      %c0_68 = arith.constant 0 : index
      %236 = vector.load %arg1[%c0_67, %c0_68] : memref<16x128xf32, #tpu.memory_space<vmem>>, vector<16x128xf32>
      %c0_69 = arith.constant 0 : index
      %c0_70 = arith.constant 0 : index
      %237 = vector.load %arg3[%c0_69, %c0_70] : memref<2x128xf32, #tpu.memory_space<vmem>>, vector<1x128xf32>
      %c1 = arith.constant 1 : index
      %c0_71 = arith.constant 0 : index
      %238 = vector.load %arg3[%c1, %c0_71] : memref<2x128xf32, #tpu.memory_space<vmem>>, vector<1x128xf32>
      %cst_72 = arith.constant dense<0.000000e+00> : vector<16xf32>
      %239 = vector.multi_reduction <add>, %236, %cst_72 [1] : vector<16x128xf32> to vector<16xf32>
      %240 = vector.shape_cast %239 : vector<16xf32> to vector<16x1xf32>
      %cst_73 = arith.constant 1.280000e+02 : f32
      %241 = vector.broadcast %cst_73 : f32 to vector<16x1xf32>
      %242 = arith.divf %240, %241 : vector<16x1xf32>
      %243 = vector.broadcast %242 : vector<16x1xf32> to vector<16x128xf32>
      %244 = arith.subf %236, %243 : vector<16x128xf32>
      %245 = arith.mulf %244, %244 : vector<16x128xf32>
      %cst_74 = arith.constant dense<0.000000e+00> : vector<16xf32>
      %246 = vector.multi_reduction <add>, %245, %cst_74 [1] : vector<16x128xf32> to vector<16xf32>
      %247 = vector.shape_cast %246 : vector<16xf32> to vector<16x1xf32>
      %cst_75 = arith.constant 1.280000e+02 : f32
      %248 = vector.broadcast %cst_75 : f32 to vector<16x1xf32>
      %249 = arith.divf %247, %248 : vector<16x1xf32>
      %250 = vector.broadcast %242 : vector<16x1xf32> to vector<16x128xf32>
      %251 = arith.subf %236, %250 : vector<16x128xf32>
      %cst_76 = arith.constant 9.99999974E-6 : f32
      %252 = vector.broadcast %cst_76 : f32 to vector<16x1xf32>
      %253 = arith.addf %249, %252 : vector<16x1xf32>
      %254 = math.rsqrt %253 : vector<16x1xf32>
      %255 = vector.broadcast %254 : vector<16x1xf32> to vector<16x128xf32>
      %256 = arith.mulf %251, %255 : vector<16x128xf32>
      %257 = vector.broadcast %237 : vector<1x128xf32> to vector<16x128xf32>
      %258 = arith.mulf %256, %257 : vector<16x128xf32>
      %259 = vector.broadcast %238 : vector<1x128xf32> to vector<16x128xf32>
      %260 = arith.addf %258, %259 : vector<16x128xf32>
      %c0_77 = arith.constant 0 : index
      %c0_78 = arith.constant 0 : index
      %261 = vector.load %arg13[%c0_77, %c0_78] : memref<16x128xf32, #tpu.memory_space<vmem>>, vector<16x128xf32>
      tpu.vector_store %arg13[%c0_77, %c0_78], %260 {strides = array<i32>} : memref<16x128xf32, #tpu.memory_space<vmem>>, vector<16x128xf32>,
    } else {
    }
    %c0 = arith.constant 0 : index
    %c0_1 = arith.constant 0 : index
    %c0_2 = arith.constant 0 : index
    %3 = vector.load %arg8[%c0, %c0_1, %c0_2] : memref<1x8x384xf32, #tpu.memory_space<vmem>>, vector<1x8x384xf32>
    %4 = vector.shape_cast %3 : vector<1x8x384xf32> to vector<8x384xf32>
    %5 = vector.extract_strided_slice %4 {offsets = [0, 0], sizes = [1, 384], strides = [1, 1]} : vector<8x384xf32> to vector<1x384xf32>
    %6 = vector.extract_strided_slice %4 {offsets = [1, 0], sizes = [1, 128], strides = [1, 1]} : vector<8x384xf32> to vector<1x128xf32>
    %7 = vector.extract_strided_slice %4 {offsets = [2, 0], sizes = [1, 256], strides = [1, 1]} : vector<8x384xf32> to vector<1x256xf32>
    %8 = vector.extract_strided_slice %4 {offsets = [3, 0], sizes = [1, 128], strides = [1, 1]} : vector<8x384xf32> to vector<1x128xf32>
    %9 = vector.extract_strided_slice %4 {offsets = [4, 0], sizes = [1, 128], strides = [1, 1]} : vector<8x384xf32> to vector<1x128xf32>
    %10 = vector.extract_strided_slice %4 {offsets = [5, 0], sizes = [1, 128], strides = [1, 1]} : vector<8x384xf32> to vector<1x128xf32>
    %11 = vector.extract_strided_slice %4 {offsets = [6, 0], sizes = [1, 128], strides = [1, 1]} : vector<8x384xf32> to vector<1x128xf32>
    %12 = vector.extract_strided_slice %4 {offsets = [7, 0], sizes = [1, 128], strides = [1, 1]} : vector<8x384xf32> to vector<1x128xf32>
    %c0_3 = arith.constant 0 : index
    %c0_4 = arith.constant 0 : index
    %13 = vector.load %arg13[%c0_3, %c0_4] : memref<16x128xf32, #tpu.memory_space<vmem>>, vector<16x128xf32>
    %14 = arith.truncf %13 : vector<16x128xf32> to vector<16x128xbf16>
    %c0_5 = arith.constant 0 : index
    %c0_6 = arith.constant 0 : index
    %c0_7 = arith.constant 0 : index
    %15 = vector.load %arg4[%c0_5, %c0_6, %c0_7] : memref<1x128x384xbf16, #tpu.memory_space<vmem>>, vector<1x128x384xbf16>
    %16 = vector.shape_cast %15 : vector<1x128x384xbf16> to vector<128x384xbf16>
    %cst = arith.constant dense<0.000000e+00> : vector<16x384xf32>
    %17 = tpu.matmul %14, %16, %cst {dimension_numbers = #tpu.dot_dimension_numbers<[1], [0], [0], [1], [0, 0, 1, 1], [], []>} : vector<16x128xbf16>, vector<128x384xbf16>, vector<16x384xf32> -> vector<16x384xf32>
    %18 = vector.broadcast %5 : vector<1x384xf32> to vector<16x384xf32>
    %19 = arith.addf %17, %18 : vector<16x384xf32>
    %c0_8 = arith.constant 0 : index
    %c0_9 = arith.constant 0 : index
    %20 = vector.load %arg2[%c0_8, %c0_9] : memref<2x8xf32, #tpu.memory_space<vmem>>, vector<2x8xf32>
    %21 = vector.shape_cast %20 : vector<2x8xf32> to vector<2x1x8xf32>
    %22 = vector.extract_strided_slice %19 {offsets = [0, 0], sizes = [16, 128], strides = [1, 1]} : vector<16x384xf32> to vector<16x128xf32>
    %cst_10 = arith.constant 0.176776692 : f32
    %23 = vector.broadcast %cst_10 : f32 to vector<16x128xf32>
    %24 = arith.mulf %22, %23 : vector<16x128xf32>
    %25 = vector.extract_strided_slice %19 {offsets = [0, 128], sizes = [16, 128], strides = [1, 1]} : vector<16x384xf32> to vector<16x128xf32>
    %26 = vector.extract_strided_slice %19 {offsets = [0, 256], sizes = [16, 128], strides = [1, 1]} : vector<16x384xf32> to vector<16x128xf32>
    %27 = vector.extract_strided_slice %24 {offsets = [0, 0], sizes = [16, 32], strides = [1, 1]} : vector<16x128xf32> to vector<16x32xf32>
    %28 = vector.shape_cast %27 : vector<16x32xf32> to vector<2x8x32xf32>
    %29 = arith.truncf %28 : vector<2x8x32xf32> to vector<2x8x32xbf16>
    %30 = vector.extract_strided_slice %25 {offsets = [0, 0], sizes = [16, 32], strides = [1, 1]} : vector<16x128xf32> to vector<16x32xf32>
    %31 = vector.shape_cast %30 : vector<16x32xf32> to vector<2x8x32xf32>
    %32 = arith.truncf %31 : vector<2x8x32xf32> to vector<2x8x32xbf16>
    %33 = vector.extract_strided_slice %26 {offsets = [0, 0], sizes = [16, 32], strides = [1, 1]} : vector<16x128xf32> to vector<16x32xf32>
    %34 = vector.shape_cast %33 : vector<16x32xf32> to vector<2x8x32xf32>
    %35 = arith.truncf %34 : vector<2x8x32xf32> to vector<2x8x32xbf16>
    "tpu.trace_start"() <{level = 10 : i32, message = "bqd,bkd->bqk"}> : () -> ()
    %cst_11 = arith.constant dense<0.000000e+00> : vector<2x8x8xf32>
    %36 = tpu.matmul %29, %32, %cst_11 {dimension_numbers = #tpu.dot_dimension_numbers<[2], [2], [1], [1], [0, 0, 0, 1, 1, 1], [0], [0]>} : vector<2x8x32xbf16>, vector<2x8x32xbf16>, vector<2x8x8xf32> -> vector<2x8x8xf32>
    "tpu.trace_stop"() : () -> ()
    %37 = vector.broadcast %21 : vector<2x1x8xf32> to vector<2x8x8xf32>
    %38 = arith.addf %36, %37 : vector<2x8x8xf32>
    %cst_12 = arith.constant dense<0xFF800000> : vector<2x8xf32>
    %39 = vector.multi_reduction <maximumf>, %38, %cst_12 [2] : vector<2x8x8xf32> to vector<2x8xf32>
    %40 = vector.shape_cast %39 : vector<2x8xf32> to vector<2x8x1xf32>
    %41 = vector.broadcast %40 : vector<2x8x1xf32> to vector<2x8x8xf32>
    %42 = arith.subf %38, %41 : vector<2x8x8xf32>
    %43 = math.exp %42 : vector<2x8x8xf32>
    %cst_13 = arith.constant dense<0.000000e+00> : vector<2x8xf32>
    %44 = vector.multi_reduction <add>, %43, %cst_13 [2] : vector<2x8x8xf32> to vector<2x8xf32>
    %45 = vector.shape_cast %44 : vector<2x8xf32> to vector<2x8x1xf32>
    %46 = tpu.reciprocal %45 {approx = true} : vector<2x8x1xf32> -> vector<2x8x1xf32>
    %47 = vector.broadcast %46 : vector<2x8x1xf32> to vector<2x8x8xf32>
    %48 = arith.mulf %43, %47 : vector<2x8x8xf32>
    %49 = arith.truncf %48 : vector<2x8x8xf32> to vector<2x8x8xbf16>
    "tpu.trace_start"() <{level = 10 : i32, message = "bqk,bkd->bqd"}> : () -> ()
    %cst_14 = arith.constant dense<0.000000e+00> : vector<2x8x32xf32>
    %50 = tpu.matmul %49, %35, %cst_14 {dimension_numbers = #tpu.dot_dimension_numbers<[2], [1], [1], [2], [0, 0, 0, 1, 1, 2], [0], [0]>} : vector<2x8x8xbf16>, vector<2x8x32xbf16>, vector<2x8x32xf32> -> vector<2x8x32xf32>
    "tpu.trace_stop"() : () -> ()
    %51 = vector.shape_cast %50 : vector<2x8x32xf32> to vector<16x32xf32>
    %52 = vector.extract_strided_slice %24 {offsets = [0, 32], sizes = [16, 32], strides = [1, 1]} : vector<16x128xf32> to vector<16x32xf32>
    %53 = vector.shape_cast %52 : vector<16x32xf32> to vector<2x8x32xf32>
    %54 = arith.truncf %53 : vector<2x8x32xf32> to vector<2x8x32xbf16>
    %55 = vector.extract_strided_slice %25 {offsets = [0, 32], sizes = [16, 32], strides = [1, 1]} : vector<16x128xf32> to vector<16x32xf32>
    %56 = vector.shape_cast %55 : vector<16x32xf32> to vector<2x8x32xf32>
    %57 = arith.truncf %56 : vector<2x8x32xf32> to vector<2x8x32xbf16>
    %58 = vector.extract_strided_slice %26 {offsets = [0, 32], sizes = [16, 32], strides = [1, 1]} : vector<16x128xf32> to vector<16x32xf32>
    %59 = vector.shape_cast %58 : vector<16x32xf32> to vector<2x8x32xf32>
    %60 = arith.truncf %59 : vector<2x8x32xf32> to vector<2x8x32xbf16>
    "tpu.trace_start"() <{level = 10 : i32, message = "bqd,bkd->bqk"}> : () -> ()
    %cst_15 = arith.constant dense<0.000000e+00> : vector<2x8x8xf32>
    %61 = tpu.matmul %54, %57, %cst_15 {dimension_numbers = #tpu.dot_dimension_numbers<[2], [2], [1], [1], [0, 0, 0, 1, 1, 1], [0], [0]>} : vector<2x8x32xbf16>, vector<2x8x32xbf16>, vector<2x8x8xf32> -> vector<2x8x8xf32>
    "tpu.trace_stop"() : () -> ()
    %62 = vector.broadcast %21 : vector<2x1x8xf32> to vector<2x8x8xf32>
    %63 = arith.addf %61, %62 : vector<2x8x8xf32>
    %cst_16 = arith.constant dense<0xFF800000> : vector<2x8xf32>
    %64 = vector.multi_reduction <maximumf>, %63, %cst_16 [2] : vector<2x8x8xf32> to vector<2x8xf32>
    %65 = vector.shape_cast %64 : vector<2x8xf32> to vector<2x8x1xf32>
    %66 = vector.broadcast %65 : vector<2x8x1xf32> to vector<2x8x8xf32>
    %67 = arith.subf %63, %66 : vector<2x8x8xf32>
    %68 = math.exp %67 : vector<2x8x8xf32>
    %cst_17 = arith.constant dense<0.000000e+00> : vector<2x8xf32>
    %69 = vector.multi_reduction <add>, %68, %cst_17 [2] : vector<2x8x8xf32> to vector<2x8xf32>
    %70 = vector.shape_cast %69 : vector<2x8xf32> to vector<2x8x1xf32>
    %71 = tpu.reciprocal %70 {approx = true} : vector<2x8x1xf32> -> vector<2x8x1xf32>
    %72 = vector.broadcast %71 : vector<2x8x1xf32> to vector<2x8x8xf32>
    %73 = arith.mulf %68, %72 : vector<2x8x8xf32>
    %74 = arith.truncf %73 : vector<2x8x8xf32> to vector<2x8x8xbf16>
    "tpu.trace_start"() <{level = 10 : i32, message = "bqk,bkd->bqd"}> : () -> ()
    %cst_18 = arith.constant dense<0.000000e+00> : vector<2x8x32xf32>
    %75 = tpu.matmul %74, %60, %cst_18 {dimension_numbers = #tpu.dot_dimension_numbers<[2], [1], [1], [2], [0, 0, 0, 1, 1, 2], [0], [0]>} : vector<2x8x8xbf16>, vector<2x8x32xbf16>, vector<2x8x32xf32> -> vector<2x8x32xf32>
    "tpu.trace_stop"() : () -> ()
    %76 = vector.shape_cast %75 : vector<2x8x32xf32> to vector<16x32xf32>
    %77 = vector.extract_strided_slice %24 {offsets = [0, 64], sizes = [16, 32], strides = [1, 1]} : vector<16x128xf32> to vector<16x32xf32>
    %78 = vector.shape_cast %77 : vector<16x32xf32> to vector<2x8x32xf32>
    %79 = arith.truncf %78 : vector<2x8x32xf32> to vector<2x8x32xbf16>
    %80 = vector.extract_strided_slice %25 {offsets = [0, 64], sizes = [16, 32], strides = [1, 1]} : vector<16x128xf32> to vector<16x32xf32>
    %81 = vector.shape_cast %80 : vector<16x32xf32> to vector<2x8x32xf32>
    %82 = arith.truncf %81 : vector<2x8x32xf32> to vector<2x8x32xbf16>
    %83 = vector.extract_strided_slice %26 {offsets = [0, 64], sizes = [16, 32], strides = [1, 1]} : vector<16x128xf32> to vector<16x32xf32>
    %84 = vector.shape_cast %83 : vector<16x32xf32> to vector<2x8x32xf32>
    %85 = arith.truncf %84 : vector<2x8x32xf32> to vector<2x8x32xbf16>
    "tpu.trace_start"() <{level = 10 : i32, message = "bqd,bkd->bqk"}> : () -> ()
    %cst_19 = arith.constant dense<0.000000e+00> : vector<2x8x8xf32>
    %86 = tpu.matmul %79, %82, %cst_19 {dimension_numbers = #tpu.dot_dimension_numbers<[2], [2], [1], [1], [0, 0, 0, 1, 1, 1], [0], [0]>} : vector<2x8x32xbf16>, vector<2x8x32xbf16>, vector<2x8x8xf32> -> vector<2x8x8xf32>
    "tpu.trace_stop"() : () -> ()
    %87 = vector.broadcast %21 : vector<2x1x8xf32> to vector<2x8x8xf32>
    %88 = arith.addf %86, %87 : vector<2x8x8xf32>
    %cst_20 = arith.constant dense<0xFF800000> : vector<2x8xf32>
    %89 = vector.multi_reduction <maximumf>, %88, %cst_20 [2] : vector<2x8x8xf32> to vector<2x8xf32>
    %90 = vector.shape_cast %89 : vector<2x8xf32> to vector<2x8x1xf32>
    %91 = vector.broadcast %90 : vector<2x8x1xf32> to vector<2x8x8xf32>
    %92 = arith.subf %88, %91 : vector<2x8x8xf32>
    %93 = math.exp %92 : vector<2x8x8xf32>
    %cst_21 = arith.constant dense<0.000000e+00> : vector<2x8xf32>
    %94 = vector.multi_reduction <add>, %93, %cst_21 [2] : vector<2x8x8xf32> to vector<2x8xf32>
    %95 = vector.shape_cast %94 : vector<2x8xf32> to vector<2x8x1xf32>
    %96 = tpu.reciprocal %95 {approx = true} : vector<2x8x1xf32> -> vector<2x8x1xf32>
    %97 = vector.broadcast %96 : vector<2x8x1xf32> to vector<2x8x8xf32>
    %98 = arith.mulf %93, %97 : vector<2x8x8xf32>
    %99 = arith.truncf %98 : vector<2x8x8xf32> to vector<2x8x8xbf16>
    "tpu.trace_start"() <{level = 10 : i32, message = "bqk,bkd->bqd"}> : () -> ()
    %cst_22 = arith.constant dense<0.000000e+00> : vector<2x8x32xf32>
    %100 = tpu.matmul %99, %85, %cst_22 {dimension_numbers = #tpu.dot_dimension_numbers<[2], [1], [1], [2], [0, 0, 0, 1, 1, 2], [0], [0]>} : vector<2x8x8xbf16>, vector<2x8x32xbf16>, vector<2x8x32xf32> -> vector<2x8x32xf32>
    "tpu.trace_stop"() : () -> ()
    %101 = vector.shape_cast %100 : vector<2x8x32xf32> to vector<16x32xf32>
    %102 = vector.extract_strided_slice %24 {offsets = [0, 96], sizes = [16, 32], strides = [1, 1]} : vector<16x128xf32> to vector<16x32xf32>
    %103 = vector.shape_cast %102 : vector<16x32xf32> to vector<2x8x32xf32>
    %104 = arith.truncf %103 : vector<2x8x32xf32> to vector<2x8x32xbf16>
    %105 = vector.extract_strided_slice %25 {offsets = [0, 96], sizes = [16, 32], strides = [1, 1]} : vector<16x128xf32> to vector<16x32xf32>
    %106 = vector.shape_cast %105 : vector<16x32xf32> to vector<2x8x32xf32>
    %107 = arith.truncf %106 : vector<2x8x32xf32> to vector<2x8x32xbf16>
    %108 = vector.extract_strided_slice %26 {offsets = [0, 96], sizes = [16, 32], strides = [1, 1]} : vector<16x128xf32> to vector<16x32xf32>
    %109 = vector.shape_cast %108 : vector<16x32xf32> to vector<2x8x32xf32>
    %110 = arith.truncf %109 : vector<2x8x32xf32> to vector<2x8x32xbf16>
    "tpu.trace_start"() <{level = 10 : i32, message = "bqd,bkd->bqk"}> : () -> ()
    %cst_23 = arith.constant dense<0.000000e+00> : vector<2x8x8xf32>
    %111 = tpu.matmul %104, %107, %cst_23 {dimension_numbers = #tpu.dot_dimension_numbers<[2], [2], [1], [1], [0, 0, 0, 1, 1, 1], [0], [0]>} : vector<2x8x32xbf16>, vector<2x8x32xbf16>, vector<2x8x8xf32> -> vector<2x8x8xf32>
    "tpu.trace_stop"() : () -> ()
    %112 = vector.broadcast %21 : vector<2x1x8xf32> to vector<2x8x8xf32>
    %113 = arith.addf %111, %112 : vector<2x8x8xf32>
    %cst_24 = arith.constant dense<0xFF800000> : vector<2x8xf32>
    %114 = vector.multi_reduction <maximumf>, %113, %cst_24 [2] : vector<2x8x8xf32> to vector<2x8xf32>
    %115 = vector.shape_cast %114 : vector<2x8xf32> to vector<2x8x1xf32>
    %116 = vector.broadcast %115 : vector<2x8x1xf32> to vector<2x8x8xf32>
    %117 = arith.subf %113, %116 : vector<2x8x8xf32>
    %118 = math.exp %117 : vector<2x8x8xf32>
    %cst_25 = arith.constant dense<0.000000e+00> : vector<2x8xf32>
    %119 = vector.multi_reduction <add>, %118, %cst_25 [2] : vector<2x8x8xf32> to vector<2x8xf32>
    %120 = vector.shape_cast %119 : vector<2x8xf32> to vector<2x8x1xf32>
    %121 = tpu.reciprocal %120 {approx = true} : vector<2x8x1xf32> -> vector<2x8x1xf32>
    %122 = vector.broadcast %121 : vector<2x8x1xf32> to vector<2x8x8xf32>
    %123 = arith.mulf %118, %122 : vector<2x8x8xf32>
    %124 = arith.truncf %123 : vector<2x8x8xf32> to vector<2x8x8xbf16>
    "tpu.trace_start"() <{level = 10 : i32, message = "bqk,bkd->bqd"}> : () -> ()
    %cst_26 = arith.constant dense<0.000000e+00> : vector<2x8x32xf32>
    %125 = tpu.matmul %124, %110, %cst_26 {dimension_numbers = #tpu.dot_dimension_numbers<[2], [1], [1], [2], [0, 0, 0, 1, 1, 2], [0], [0]>} : vector<2x8x8xbf16>, vector<2x8x32xbf16>, vector<2x8x32xf32> -> vector<2x8x32xf32>
    "tpu.trace_stop"() : () -> ()
    %126 = vector.shape_cast %125 : vector<2x8x32xf32> to vector<16x32xf32>
    %127 = tpu.concatenate %51, %76, %101, %126 in 1 : vector<16x32xf32>, vector<16x32xf32>, vector<16x32xf32>, vector<16x32xf32> -> vector<16x128xf32>
    %128 = arith.truncf %127 : vector<16x128xf32> to vector<16x128xbf16>
    %c0_27 = arith.constant 0 : index
    %c0_28 = arith.constant 0 : index
    %c0_29 = arith.constant 0 : index
    %129 = vector.load %arg5[%c0_27, %c0_28, %c0_29] : memref<1x128x128xbf16, #tpu.memory_space<vmem>>, vector<1x128x128xbf16>
    %130 = vector.shape_cast %129 : vector<1x128x128xbf16> to vector<128x128xbf16>
    %cst_30 = arith.constant dense<0.000000e+00> : vector<16x128xf32>
    %131 = tpu.matmul %128, %130, %cst_30 {dimension_numbers = #tpu.dot_dimension_numbers<[1], [0], [0], [1], [0, 0, 1, 1], [], []>} : vector<16x128xbf16>, vector<128x128xbf16>, vector<16x128xf32> -> vector<16x128xf32>
    %132 = vector.broadcast %6 : vector<1x128xf32> to vector<16x128xf32>
    %133 = arith.addf %131, %132 : vector<16x128xf32>
    %134 = arith.addf %133, %13 : vector<16x128xf32>
    %cst_31 = arith.constant dense<0.000000e+00> : vector<16xf32>
    %135 = vector.multi_reduction <add>, %134, %cst_31 [1] : vector<16x128xf32> to vector<16xf32>
    %136 = vector.shape_cast %135 : vector<16xf32> to vector<16x1xf32>
    %cst_32 = arith.constant 1.280000e+02 : f32
    %137 = vector.broadcast %cst_32 : f32 to vector<16x1xf32>
    %138 = arith.divf %136, %137 : vector<16x1xf32>
    %139 = vector.broadcast %138 : vector<16x1xf32> to vector<16x128xf32>
    %140 = arith.subf %134, %139 : vector<16x128xf32>
    %141 = arith.mulf %140, %140 : vector<16x128xf32>
    %cst_33 = arith.constant dense<0.000000e+00> : vector<16xf32>
    %142 = vector.multi_reduction <add>, %141, %cst_33 [1] : vector<16x128xf32> to vector<16xf32>
    %143 = vector.shape_cast %142 : vector<16xf32> to vector<16x1xf32>
    %cst_34 = arith.constant 1.280000e+02 : f32
    %144 = vector.broadcast %cst_34 : f32 to vector<16x1xf32>
    %145 = arith.divf %143, %144 : vector<16x1xf32>
    %146 = vector.broadcast %138 : vector<16x1xf32> to vector<16x128xf32>
    %147 = arith.subf %134, %146 : vector<16x128xf32>
    %cst_35 = arith.constant 9.99999974E-6 : f32
    %148 = vector.broadcast %cst_35 : f32 to vector<16x1xf32>
    %149 = arith.addf %145, %148 : vector<16x1xf32>
    %150 = math.rsqrt %149 : vector<16x1xf32>
    %151 = vector.broadcast %150 : vector<16x1xf32> to vector<16x128xf32>
    %152 = arith.mulf %147, %151 : vector<16x128xf32>
    %153 = vector.broadcast %9 : vector<1x128xf32> to vector<16x128xf32>
    %154 = arith.mulf %152, %153 : vector<16x128xf32>
    %155 = vector.broadcast %10 : vector<1x128xf32> to vector<16x128xf32>
    %156 = arith.addf %154, %155 : vector<16x128xf32>
    %157 = arith.truncf %156 : vector<16x128xf32> to vector<16x128xbf16>
    %c0_36 = arith.constant 0 : index
    %c0_37 = arith.constant 0 : index
    %c0_38 = arith.constant 0 : index
    %158 = vector.load %arg6[%c0_36, %c0_37, %c0_38] : memref<1x128x256xbf16, #tpu.memory_space<vmem>>, vector<1x128x256xbf16>
    %159 = vector.shape_cast %158 : vector<1x128x256xbf16> to vector<128x256xbf16>
    %cst_39 = arith.constant dense<0.000000e+00> : vector<16x256xf32>
    %160 = tpu.matmul %157, %159, %cst_39 {dimension_numbers = #tpu.dot_dimension_numbers<[1], [0], [0], [1], [0, 0, 1, 1], [], []>} : vector<16x128xbf16>, vector<128x256xbf16>, vector<16x256xf32> -> vector<16x256xf32>
    %161 = vector.broadcast %7 : vector<1x256xf32> to vector<16x256xf32>
    %162 = arith.addf %160, %161 : vector<16x256xf32>
    %cst_40 = arith.constant 5.000000e-01 : f32
    %163 = vector.broadcast %cst_40 : f32 to vector<16x256xf32>
    %164 = arith.mulf %163, %162 : vector<16x256xf32>
    %cst_41 = arith.constant 0.707106769 : f32
    %165 = vector.broadcast %cst_41 : f32 to vector<16x256xf32>
    %166 = arith.mulf %162, %165 : vector<16x256xf32>
    %cst_42 = arith.constant 0.000000e+00 : f32
    %167 = vector.broadcast %cst_42 : f32 to vector<16x256xf32>
    %168 = arith.cmpf olt, %166, %167 : vector<16x256xf32>
    %cst_43 = arith.constant -1.000000e+00 : f32
    %cst_44 = arith.constant 1.000000e+00 : f32
    %169 = vector.broadcast %cst_43 : f32 to vector<16x256xf32>
    %170 = vector.broadcast %cst_44 : f32 to vector<16x256xf32>
    %171 = arith.select %168, %169, %170 : vector<16x256xi1>, vector<16x256xf32>
    %172 = math.absf %166 : vector<16x256xf32>
    %cst_45 = arith.constant 0.327591091 : f32
    %173 = vector.broadcast %cst_45 : f32 to vector<16x256xf32>
    %174 = arith.mulf %173, %172 : vector<16x256xf32>
    %cst_46 = arith.constant 1.000000e+00 : f32
    %175 = vector.broadcast %cst_46 : f32 to vector<16x256xf32>
    %176 = arith.addf %175, %174 : vector<16x256xf32>
    %177 = tpu.reciprocal %176 {approx = true} : vector<16x256xf32> -> vector<16x256xf32>
    %cst_47 = arith.constant 1.06140542 : f32
    %178 = vector.broadcast %cst_47 : f32 to vector<16x256xf32>
    %179 = arith.mulf %178, %177 : vector<16x256xf32>
    %cst_48 = arith.constant -1.45315206 : f32
    %180 = vector.broadcast %cst_48 : f32 to vector<16x256xf32>
    %181 = arith.addf %179, %180 : vector<16x256xf32>
    %182 = arith.mulf %181, %177 : vector<16x256xf32>
    %cst_49 = arith.constant 1.42141378 : f32
    %183 = vector.broadcast %cst_49 : f32 to vector<16x256xf32>
    %184 = arith.addf %182, %183 : vector<16x256xf32>
    %185 = arith.mulf %184, %177 : vector<16x256xf32>
    %cst_50 = arith.constant -0.284496725 : f32
    %186 = vector.broadcast %cst_50 : f32 to vector<16x256xf32>
    %187 = arith.addf %185, %186 : vector<16x256xf32>
    %188 = arith.mulf %187, %177 : vector<16x256xf32>
    %cst_51 = arith.constant 0.254829586 : f32
    %189 = vector.broadcast %cst_51 : f32 to vector<16x256xf32>
    %190 = arith.addf %188, %189 : vector<16x256xf32>
    %191 = arith.mulf %190, %177 : vector<16x256xf32>
    %cst_52 = arith.constant 0.000000e+00 : f32
    %192 = vector.broadcast %cst_52 : f32 to vector<16x256xf32>
    %193 = arith.subf %192, %172 : vector<16x256xf32>
    %194 = arith.mulf %193, %172 : vector<16x256xf32>
    %195 = math.exp %194 : vector<16x256xf32>
    %196 = arith.mulf %191, %195 : vector<16x256xf32>
    %cst_53 = arith.constant 1.000000e+00 : f32
    %197 = vector.broadcast %cst_53 : f32 to vector<16x256xf32>
    %198 = arith.subf %197, %196 : vector<16x256xf32>
    %199 = arith.mulf %171, %198 : vector<16x256xf32>
    %cst_54 = arith.constant 1.000000e+00 : f32
    %200 = vector.broadcast %cst_54 : f32 to vector<16x256xf32>
    %201 = arith.addf %200, %199 : vector<16x256xf32>
    %202 = arith.mulf %164, %201 : vector<16x256xf32>
    %203 = arith.truncf %202 : vector<16x256xf32> to vector<16x256xbf16>
    %c0_55 = arith.constant 0 : index
    %c0_56 = arith.constant 0 : index
    %c0_57 = arith.constant 0 : index
    %204 = vector.load %arg7[%c0_55, %c0_56, %c0_57] : memref<1x256x128xbf16, #tpu.memory_space<vmem>>, vector<1x256x128xbf16>
    %205 = vector.shape_cast %204 : vector<1x256x128xbf16> to vector<256x128xbf16>
    %cst_58 = arith.constant dense<0.000000e+00> : vector<16x128xf32>
    %206 = tpu.matmul %203, %205, %cst_58 {dimension_numbers = #tpu.dot_dimension_numbers<[1], [0], [0], [1], [0, 0, 1, 1], [], []>} : vector<16x256xbf16>, vector<256x128xbf16>, vector<16x128xf32> -> vector<16x128xf32>
    %207 = vector.broadcast %8 : vector<1x128xf32> to vector<16x128xf32>
    %208 = arith.addf %206, %207 : vector<16x128xf32>
    %209 = arith.addf %208, %156 : vector<16x128xf32>
    %cst_59 = arith.constant dense<0.000000e+00> : vector<16xf32>
    %210 = vector.multi_reduction <add>, %209, %cst_59 [1] : vector<16x128xf32> to vector<16xf32>
    %211 = vector.shape_cast %210 : vector<16xf32> to vector<16x1xf32>
    %cst_60 = arith.constant 1.280000e+02 : f32
    %212 = vector.broadcast %cst_60 : f32 to vector<16x1xf32>
    %213 = arith.divf %211, %212 : vector<16x1xf32>
    %214 = vector.broadcast %213 : vector<16x1xf32> to vector<16x128xf32>
    %215 = arith.subf %209, %214 : vector<16x128xf32>
    %216 = arith.mulf %215, %215 : vector<16x128xf32>
    %cst_61 = arith.constant dense<0.000000e+00> : vector<16xf32>
    %217 = vector.multi_reduction <add>, %216, %cst_61 [1] : vector<16x128xf32> to vector<16xf32>
    %218 = vector.shape_cast %217 : vector<16xf32> to vector<16x1xf32>
    %cst_62 = arith.constant 1.280000e+02 : f32
    %219 = vector.broadcast %cst_62 : f32 to vector<16x1xf32>
    %220 = arith.divf %218, %219 : vector<16x1xf32>
    %221 = vector.broadcast %213 : vector<16x1xf32> to vector<16x128xf32>
    %222 = arith.subf %209, %221 : vector<16x128xf32>
    %cst_63 = arith.constant 9.99999974E-6 : f32
    %223 = vector.broadcast %cst_63 : f32 to vector<16x1xf32>
    %224 = arith.addf %220, %223 : vector<16x1xf32>
    %225 = math.rsqrt %224 : vector<16x1xf32>
    %226 = vector.broadcast %225 : vector<16x1xf32> to vector<16x128xf32>
    %227 = arith.mulf %222, %226 : vector<16x128xf32>
    %228 = vector.broadcast %11 : vector<1x128xf32> to vector<16x128xf32>
    %229 = arith.mulf %227, %228 : vector<16x128xf32>
    %230 = vector.broadcast %12 : vector<1x128xf32> to vector<16x128xf32>
    %231 = arith.addf %229, %230 : vector<16x128xf32>
    %c0_64 = arith.constant 0 : index
    %c0_65 = arith.constant 0 : index
    %232 = vector.load %arg13[%c0_64, %c0_65] : memref<16x128xf32, #tpu.memory_space<vmem>>, vector<16x128xf32>
    tpu.vector_store %arg13[%c0_64, %c0_65], %231 {strides = array<i32>} : memref<16x128xf32, #tpu.memory_space<vmem>>, vector<16x128xf32>,
    %c1_i32 = arith.constant 1 : i32
    %233 = arith.cmpi eq, %arg0, %c1_i32 : i32
    %234 = arith.extui %233 : i1 to i32
    %c0_i32_66 = arith.constant 0 : i32
    %235 = arith.cmpi ne, %234, %c0_i32_66 : i32
    scf.if %235 {
      %236 = vector.shape_cast %231 : vector<16x128xf32> to vector<2x8x128xf32>
      %237 = vector.extract_strided_slice %236 {offsets = [0, 0, 0], sizes = [2, 1, 128], strides = [1, 1, 1]} : vector<2x8x128xf32> to vector<2x1x128xf32>
      %238 = vector.shape_cast %237 : vector<2x1x128xf32> to vector<2x128xf32>
      %239 = arith.truncf %238 : vector<2x128xf32> to vector<2x128xbf16>
      %c0_67 = arith.constant 0 : index
      %c0_68 = arith.constant 0 : index
      %240 = vector.load %arg9[%c0_67, %c0_68] : memref<128x128xbf16, #tpu.memory_space<vmem>>, vector<128x128xbf16>
      %cst_69 = arith.constant dense<0.000000e+00> : vector<2x128xf32>
      %241 = tpu.matmul %239, %240, %cst_69 {dimension_numbers = #tpu.dot_dimension_numbers<[1], [0], [0], [1], [0, 0, 1, 1], [], []>} : vector<2x128xbf16>, vector<128x128xbf16>, vector<2x128xf32> -> vector<2x128xf32>
      %c0_70 = arith.constant 0 : index
      %c0_71 = arith.constant 0 : index
      %242 = vector.load %arg10[%c0_70, %c0_71] : memref<2x128xf32, #tpu.memory_space<vmem>>, vector<1x128xf32>
      %243 = vector.broadcast %242 : vector<1x128xf32> to vector<2x128xf32>
      %244 = arith.addf %241, %243 : vector<2x128xf32>
      %245 = arith.truncf %244 : vector<2x128xf32> to vector<2x128xbf16>
      %c0_72 = arith.constant 0 : index
      %c0_73 = arith.constant 0 : index
      %246 = vector.load %arg11[%c0_72, %c0_73] : memref<128x128xbf16, #tpu.memory_space<vmem>>, vector<128x128xbf16>
      %cst_74 = arith.constant dense<0.000000e+00> : vector<2x128xf32>
      %247 = tpu.matmul %245, %246, %cst_74 {dimension_numbers = #tpu.dot_dimension_numbers<[1], [0], [0], [1], [0, 0, 1, 1], [], []>} : vector<2x128xbf16>, vector<128x128xbf16>, vector<2x128xf32> -> vector<2x128xf32>
      %c1 = arith.constant 1 : index
      %c0_75 = arith.constant 0 : index
      %248 = vector.load %arg10[%c1, %c0_75] : memref<2x128xf32, #tpu.memory_space<vmem>>, vector<1x128xf32>
      %249 = vector.broadcast %248 : vector<1x128xf32> to vector<2x128xf32>
      %250 = arith.addf %247, %249 : vector<2x128xf32>
      %c0_76 = arith.constant 0 : index
      %c0_77 = arith.constant 0 : index
      %251 = vector.load %arg12[%c0_76, %c0_77] : memref<2x128xf32, #tpu.memory_space<vmem>>, vector<2x128xf32>
      tpu.vector_store %arg12[%c0_76, %c0_77], %250 {strides = array<i32>} : memref<2x128xf32, #tpu.memory_space<vmem>>, vector<2x128xf32>,
    } else {
    }
    return
  }
  func.func @transform_0(%arg0: i32) -> (i32, i32) {
    %c0_i32 = arith.constant 0 : i32
    %c0_i32_0 = arith.constant 0 : i32
    %c0_i32_1 = arith.constant 0 : i32
    return %c0_i32, %c0_i32_0 : i32, i32
  }
  func.func @transform_1(%arg0: i32) -> (i32, i32) {
    %c0_i32 = arith.constant 0 : i32
    %c0_i32_0 = arith.constant 0 : i32
    %c0_i32_1 = arith.constant 0 : i32
    return %c0_i32, %c0_i32_0 : i32, i32
  }
  func.func @transform_2(%arg0: i32) -> (i32, i32) {
    %c0_i32 = arith.constant 0 : i32
    %c0_i32_0 = arith.constant 0 : i32
    %c0_i32_1 = arith.constant 0 : i32
    return %c0_i32, %c0_i32_0 : i32, i32
  }
  func.func @transform_3(%arg0: i32) -> (i32, i32, i32) {
    %c0_i32 = arith.constant 0 : i32
    %c0_i32_0 = arith.constant 0 : i32
    %c0_i32_1 = arith.constant 0 : i32
    return %arg0, %c0_i32, %c0_i32_0 : i32, i32, i32
  }
  func.func @transform_4(%arg0: i32) -> (i32, i32, i32) {
    %c0_i32 = arith.constant 0 : i32
    %c0_i32_0 = arith.constant 0 : i32
    %c0_i32_1 = arith.constant 0 : i32
    return %arg0, %c0_i32, %c0_i32_0 : i32, i32, i32
  }
  func.func @transform_5(%arg0: i32) -> (i32, i32, i32) {
    %c0_i32 = arith.constant 0 : i32
    %c0_i32_0 = arith.constant 0 : i32
    %c0_i32_1 = arith.constant 0 : i32
    return %arg0, %c0_i32, %c0_i32_0 : i32, i32, i32
  }
  func.func @transform_6(%arg0: i32) -> (i32, i32, i32) {
    %c0_i32 = arith.constant 0 : i32
    %c0_i32_0 = arith.constant 0 : i32
    %c0_i32_1 = arith.constant 0 : i32
    return %arg0, %c0_i32, %c0_i32_0 : i32, i32, i32
  }
  func.func @transform_7(%arg0: i32) -> (i32, i32, i32) {
    %c0_i32 = arith.constant 0 : i32
    %c0_i32_0 = arith.constant 0 : i32
    %c0_i32_1 = arith.constant 0 : i32
    return %arg0, %c0_i32, %c0_i32_0 : i32, i32, i32
  }
  func.func @transform_8(%arg0: i32) -> (i32, i32) {
    %c0_i32 = arith.constant 0 : i32
    %c0_i32_0 = arith.constant 0 : i32
    %c0_i32_1 = arith.constant 0 : i32
    return %c0_i32, %c0_i32_0 : i32, i32
  }
  func.func @transform_9(%arg0: i32) -> (i32, i32) {
    %c0_i32 = arith.constant 0 : i32
    %c0_i32_0 = arith.constant 0 : i32
    %c0_i32_1 = arith.constant 0 : i32
    return %c0_i32, %c0_i32_0 : i32, i32
  }
  func.func @transform_10(%arg0: i32) -> (i32, i32) {
    %c0_i32 = arith.constant 0 : i32
    %c0_i32_0 = arith.constant 0 : i32
    %c0_i32_1 = arith.constant 0 : i32
    return %c0_i32, %c0_i32_0 : i32, i32
  }
  func.func @transform_11(%arg0: i32) -> (i32, i32) {
    %c0_i32 = arith.constant 0 : i32
    %c0_i32_0 = arith.constant 0 : i32
    %c0_i32_1 = arith.constant 0 : i32
    return %c0_i32, %c0_i32_0 : i32, i32
  }
}

</mosaic_0001>

<bundles_post_ra>
// kernel: xlmr_forward.1
= control target key start
LH: loop header
LB: loop body
LE: loop exit
PB: predicated region body
PF: predicated region fallthrough
CT: control target
= control target key end

     0   :  { %s4406_s0 = inlined_call_operand.vmem [shape: f32[16,128], index: 0, kind: input, shape index: {}]   ;;  %s4407_s1 = inlined_call_operand.vmem [shape: f32[2,8], index: 1, kind: input, shape index: {}]   ;;  %s4408_s2 = inlined_call_operand.vmem [shape: f32[2,128], index: 2, kind: input, shape index: {}]   ;;  %s4409_s3 = inlined_call_operand.hbm [shape: bf16[2,128,384], index: 3, kind: input, shape index: {}]   ;;  %s4410_s4 = inlined_call_operand.hbm [shape: bf16[2,128,128], index: 4, kind: input, shape index: {}]   ;;  %s4411_s5 = inlined_call_operand.vmem [shape: bf16[2,128,256], index: 5, kind: input, shape index: {}]   ;;  %s4412_s6 = inlined_call_operand.hbm [shape: bf16[2,256,128], index: 6, kind: input, shape index: {}]   ;;  %s4413_s7 = inlined_call_operand.hbm [shape: f32[2,8,384], index: 7, kind: input, shape index: {}]   ;;  %s4414_s8 = inlined_call_operand.vmem [shape: bf16[128,128], index: 8, kind: input, shape index: {}]   ;;  %s4415_s9 = inlined_call_operand.vmem [shape: f32[2,128], index: 9, kind: input, shape index: {}]   ;;  %s4416_s10 = inlined_call_operand.hbm [shape: bf16[128,128], index: 10, kind: input, shape index: {}]   ;;  %s4417_s11 = inlined_call_operand.hbm [shape: f32[2,128], index: 11, kind: output, shape index: {}]  }
   0x1   :  { %4428 = sst [smem:[#allocation21_spill]] %s4410_s4 }
   0x2   :  { %4429 = sst [smem:[#allocation22_spill]] %s4414_s8 }
   0x3   :  { %4430 = sst [smem:[#allocation23_spill]] %s4415_s9 }
   0x4   :  { %4431 = sst [smem:[#allocation24_spill]] %s4417_s11 }
   0x5   :  { %16 = vsyncpa [#allocation4], 0 }
   0x6   :  { %18 = vsyncpa [#allocation4 + $0x1], 0 }
   0x7   :  { %19 = vsyncpa [#allocation7], 0 }
   0x8   :  { %21 = vsyncpa [#allocation7 + $0x1], 0 }
   0x9   :  { %22 = vsyncpa [#allocation10], 0 }
   0xa   :  { %24 = vsyncpa [#allocation10 + $0x1], 0 }
   0xb   :  { %25 = vsyncpa [#allocation5], 0  ;;  %s3744_s17 = smov 0   ;;  %s3746_s18 = smov 0  }
   0xc   :  { %s3748_s19 = smov 0   ;;  %s3750_s20 = smov 0  }
   0xd LB: > { %4432 = sst [smem:[#allocation18_spill]] %s3658_s19  ;;  %s3763_s21 = sadd.s32 4294967295, %s3662_s20   ;;  %s3662_s20 = sphi %s3750_s20, %s4454_s20   ;;  %s3658_s19 = sphi %s3748_s19, %s4456_s19   ;;  %s3654_s18 = sphi %s3746_s18, %s4458_s18   ;;  %s3650_s17 = sphi %s3744_s17, %s4457_s17  }
   0xe   : > { %s3766_s22 = sadd.s32 1, %s3662_s20   ;;  %s101_s24 = sadd.s32 1, %s3658_s19 }
   0xf   : > { %4433 = sst [smem:[#allocation19_spill]] %s3766_s22  ;;  %s98_s23 = ssub.s32 %s3662_s20, %s3766_s22 }
  0x10   : > { %p99_p0 = scmp.eq.s32.totalorder %s98_s23, 0  ;;  %p108_p1 = scmp.ne.s32.totalorder %s3658_s19, %s3654_s18 }
  0x11   : > { %p109_p2 = scmp.eq.s32.totalorder %s3662_s20, 0  ;;  %p114_p3 = scmp.ne.s32.totalorder %s3654_s18, %s3650_s17 }
  0x12   : > { %s3776_s25 = scalar_select %p99_p0, %s3658_s19, %s101_s24  }
  0x13   : > { %p3778_p4 = por %p109_p2, %p108_p1  ;;  %p4418_p5 = scmp.eq.s32.totalorder %s3763_s21, 0 }
  0x14   : > { %4434 = sst [smem:[#allocation20_spill]] %s3776_s25  ;;  %p2793_p6 = scmp.ge.s32.totalorder %s3662_s20, 1 }
  0x15   : > { %p313_p7 = scmp.lt.s32.totalorder %s3662_s20, 3  ;;  %p3787_p8 = por %p4418_p5, %p114_p3 }
  0x16   : > { %s3664_s29 = smov [#allocation11]   ;;  %p3226_p13 = scmp.lt.s32.totalorder %s3662_s20, 2 }
  0x17   : > { %s4436_s27 = scalar_select %p3787_p8, 1, 0 }
  0x18   : > { %p3792_p10 = pnand %p2793_p6, %p313_p7  ;;  %s340_s30 = sshll.u32 %s3664_s29, 4  ;;  %s341_s30 = int_to_ptr.vmem [resolvable:$true] %s340_s30 }
  0x19   : > { %s3806_s13 = sand.u32 1, %s3658_s19   ;;  %p3811_p0 = pnand %p3226_p13, %p3778_p4 }
  0x1a   : > { %s4437_s28 = scalar_select %p3792_p10, 1, 0 }
  0x1b   : > { %p3208_p11 = pneg %p3792_p10  ;;  %s3461_s16 = scalar_lea.vmem %s341_s30, 1024 }
  0x1c   : > { %p3462_p2 = scmp.ne.s32.totalorder %s341_s30, %s3461_s16  ;;  %p3469_p7 = scmp.lt.s32.totalorder %s341_s30, %s341_s30 }
  0x1d   : > { %p3800_p12 = pnand %p3208_p11, %p4418_p5  ;;  %p3470_p11 = scmp.lt.s32.totalorder %s3461_s16, %s3461_s16 }
  0x1f   : > { %p3452_p1 = pneg %p3800_p12  ;;  %p3471_p9 = por %p3470_p11, %p3469_p7 }
  0x21   : > { %p3464_p3 = pnand %p3462_p2, %p3452_p1 }
  0x23   : > { %p3465_p6 = pneg %p3464_p3 }
  0x25   : > { %p3472_p5 = pnand %p3471_p9, %p3465_p6 }
  0x27   : > { %3475 = shalt.err (!%p3472_p5)
}
  0x28   : > { %s4426_s17 = smov 64   ;;  %s4427_s23 = smov 4  }
  0x29   : > { %3211 = dma.hbm_to_vmem [thread:$0]  (!%p3800_p12), %s4416_s10, 1024, %s341_s30, [#allocation10], %s4426_s17, %s4426_s17, %s4427_s23  }
  0x2a   : > { %s2797_s29 = sshll.u32 %s3806_s13, 6  ;;  %s2917_s16 = sshll.u32 %s3662_s20, 10 }
  0x2b   : > { %s4440_s4 = sld [smem:[#allocation21_spill]]  ;;  %s379_s22 = scalar_lea.vmem [#allocation6], %s2797_s29 }
  0x2c   : > { %s386_s11 = sshll.u32 %s379_s22, 4  ;;  %s3186_s12 = smul.u32 192, %s3806_s13  ;;  %s3832_s11 = int_to_ptr.vmem [resolvable:$true] %s386_s11 }
  0x2d   : > { %s4441_s9 = sand.u32 1, %s3662_s20   ;;  %p3843_p5 = pneg %p3811_p0 }
  0x2e   : > { %s3837_s8 = scalar_lea.sflag [#allocation7], %s4441_s9 }
  0x31   : > { %s3830_s19 = scalar_lea.hbm %s4440_s4, %s2917_s16  ;;  %s3481_s22 = scalar_lea.hbm %s4440_s4, 2048 }
  0x32   : > { %s3476_s24 = scalar_lea.hbm %s3830_s19, 1024  ;;  %p3482_p13 = scmp.lt.s32.totalorder %s3830_s19, %s4440_s4 }
  0x33   : > { %p3477_p4 = scmp.ne.s32.totalorder %s3830_s19, %s3476_s24  ;;  %p3483_p1 = scmp.lt.s32.totalorder %s3481_s22, %s3476_s24 }
  0x35   : > { %p3479_p9 = pnand %p3843_p5, %p3477_p4  ;;  %p3484_p2 = por %p3483_p1, %p3482_p13 }
  0x37   : > { %p3480_p12 = pneg %p3479_p9 }
  0x39   : > { %p3485_p3 = pnand %p3484_p2, %p3480_p12 }
  0x3b   : > { %3488 = shalt.err (!%p3485_p3)
}
  0x3c   : > { %s3489_s9 = scalar_lea.vmem %s3832_s11, 1024  ;;  %s3667_s16 = smov [#allocation6]  }
  0x3d   : > { %p3490_p6 = scmp.ne.s32.totalorder %s3832_s11, %s3489_s9  ;;  %s3494_s25 = sshll.u32 %s3667_s16, 4  ;;  %s3495_s25 = int_to_ptr.vmem [resolvable:$false] %s3494_s25 }
  0x3e   : > { %s3496_s14 = scalar_lea.vmem %s3495_s25, 2048  ;;  %p3497_p4 = scmp.lt.s32.totalorder %s3832_s11, %s3495_s25 }
  0x3f   : > { %p3492_p7 = pnand %p3490_p6, %p3843_p5  ;;  %p3498_p9 = scmp.lt.s32.totalorder %s3496_s14, %s3489_s9 }
  0x41   : > { %p3493_p11 = pneg %p3492_p7  ;;  %p3499_p8 = por %p3498_p9, %p3497_p4 }
  0x43   : > { %p3500_p10 = pnand %p3499_p8, %p3493_p11 }
  0x45   : > { %3503 = shalt.err (!%p3500_p10)
}
  0x46   : > { %3218 = dma.hbm_to_vmem [thread:$0]  (!%p3811_p0), %s3830_s19, 1024, %s3832_s11, %s3837_s8, %s4426_s17, %s4426_s17, %s4427_s23  }
  0x47   : > { %s3187_s24 = smul.u32 3072, %s3662_s20  ;;  %s358_s22 = scalar_lea.vmem [#allocation3], %s3186_s12 }
  0x48   : > { %s365_s26 = sshll.u32 %s358_s22, 4  ;;  %s2800_s25 = sshll.u32 %s3806_s13, 7  ;;  %s3877_s26 = int_to_ptr.vmem [resolvable:$true] %s365_s26 }
  0x49   : > { %s3875_s16 = scalar_lea.hbm %s4409_s3, %s3187_s24  ;;  %s355_s14 = scalar_lea.sflag [#allocation4], %s3806_s13 }
  0x4a   : > { %s3504_s4 = scalar_lea.hbm %s3875_s16, 3072  ;;  %s3509_s12 = scalar_lea.hbm %s4409_s3, 6144 }
  0x4b   : > { %p3505_p8 = scmp.ne.s32.totalorder %s3875_s16, %s3504_s4  ;;  %p3510_p13 = scmp.lt.s32.totalorder %s3875_s16, %s4409_s3 }
  0x4c   : > { %p3511_p1 = scmp.lt.s32.totalorder %s3509_s12, %s3504_s4 }
  0x4d   : > { %p3507_p10 = pnand %p3505_p8, %p3843_p5 }
  0x4e   : > { %p3512_p2 = por %p3511_p1, %p3510_p13 }
  0x4f   : > { %p3508_p12 = pneg %p3507_p10 }
  0x51   : > { %p3513_p3 = pnand %p3512_p2, %p3508_p12 }
  0x53   : > { %3516 = shalt.err (!%p3513_p3)
}
  0x54   : > { %s3517_s24 = scalar_lea.vmem %s3877_s26, 3072  ;;  %s3668_s9 = smov [#allocation3]  }
  0x55   : > { %p3518_p6 = scmp.ne.s32.totalorder %s3877_s26, %s3517_s24  ;;  %s3522_s11 = sshll.u32 %s3668_s9, 4  ;;  %s3523_s11 = int_to_ptr.vmem [resolvable:$false] %s3522_s11 }
  0x56   : > { %s3524_s19 = scalar_lea.vmem %s3523_s11, 6144  ;;  %p3525_p4 = scmp.lt.s32.totalorder %s3877_s26, %s3523_s11 }
  0x57   : > { %p3520_p7 = pnand %p3518_p6, %p3843_p5  ;;  %p3526_p9 = scmp.lt.s32.totalorder %s3524_s19, %s3517_s24 }
  0x59   : > { %p3521_p11 = pneg %p3520_p7  ;;  %p3527_p8 = por %p3526_p9, %p3525_p4 }
  0x5b   : > { %p3528_p10 = pnand %p3527_p8, %p3521_p11 }
  0x5d   : > { %3531 = shalt.err (!%p3528_p10)
}
  0x5e   : > { %s3669_s4 = smov 192   ;;  %s3670_s12 = smov 12  }
  0x5f   : > { %3215 = dma.hbm_to_vmem [thread:$0]  (!%p3811_p0), %s3875_s16, 3072, %s3877_s26, %s355_s14, %s3669_s4, %s3669_s4, %s3670_s12  }
  0x60   : > { %s2918_s22 = sshll.u32 %s3662_s20, 11  ;;  %s408_s11 = scalar_lea.vmem [#allocation8], %s2800_s25 }
  0x61   : > { %s3907_s24 = scalar_lea.hbm %s4412_s6, %s2918_s22  ;;  %s415_s19 = sshll.u32 %s408_s11, 4  ;;  %s416_s19 = int_to_ptr.vmem [resolvable:$true] %s415_s19 }
  0x62   : > { %s3532_s17 = scalar_lea.hbm %s3907_s24, 2048  ;;  %s3537_s16 = scalar_lea.hbm %s4412_s6, 4096 }
  0x63   : > { %p3533_p12 = scmp.ne.s32.totalorder %s3907_s24, %s3532_s17  ;;  %p3538_p2 = scmp.lt.s32.totalorder %s3907_s24, %s4412_s6 }
  0x64   : > { %p3539_p3 = scmp.lt.s32.totalorder %s3537_s16, %s3532_s17 }
  0x65   : > { %p3535_p13 = pnand %p3533_p12, %p3843_p5 }
  0x66   : > { %p3540_p6 = por %p3539_p3, %p3538_p2 }
  0x67   : > { %p3536_p1 = pneg %p3535_p13 }
  0x69   : > { %p3541_p7 = pnand %p3540_p6, %p3536_p1 }
  0x6b   : > { %3544 = shalt.err (!%p3541_p7)
}
  0x6c   : > { %s3545_s25 = scalar_lea.vmem %s416_s19, 2048  ;;  %s3671_s12 = smov [#allocation8]  }
  0x6d   : > { %p3546_p11 = scmp.ne.s32.totalorder %s416_s19, %s3545_s25  ;;  %s3550_s22 = sshll.u32 %s3671_s12, 4  ;;  %s3551_s22 = int_to_ptr.vmem [resolvable:$false] %s3550_s22 }
  0x6e   : > { %s3552_s29 = scalar_lea.vmem %s3551_s22, 4096  ;;  %p3553_p8 = scmp.lt.s32.totalorder %s416_s19, %s3551_s22 }
  0x6f   : > { %p3548_p4 = pnand %p3546_p11, %p3843_p5  ;;  %p3554_p10 = scmp.lt.s32.totalorder %s3552_s29, %s3545_s25 }
  0x71   : > { %p3549_p9 = pneg %p3548_p4  ;;  %p3555_p12 = por %p3554_p10, %p3553_p8 }
  0x73   : > { %p3556_p13 = pnand %p3555_p12, %p3549_p9 }
  0x75   : > { %3559 = shalt.err (!%p3556_p13)
}
  0x76   : > { %s4443_s17 = smov 4   ;;  %s4444_s23 = smov 64  }
  0x77   : > { %3221 = dma.hbm_to_vmem [thread:$0]  (!%p3811_p0), %s3907_s24, 2048, %s416_s19, %s3837_s8, %s4444_s23, %s4444_s23, %s4443_s17  }
  0x78   : > { %s3188_s9 = smul.u32 24, %s3806_s13  ;;  %s4445_s12 = sand.u32 1, %s3662_s20  }
  0x79   : > { %s3189_s11 = smul.u32 384, %s3662_s20  ;;  %s426_s22 = scalar_lea.sflag [#allocation10], %s4445_s12 }
  0x7a   : > { %s429_s4 = scalar_lea.vmem [#allocation9], %s3188_s9  ;;  %s3565_s24 = scalar_lea.hbm %s4413_s7, 768 }
  0x7b   : > { %s3936_s14 = scalar_lea.hbm %s4413_s7, %s3189_s11  ;;  %s437_s25 = sshll.u32 %s429_s4, 4  ;;  %s438_s25 = int_to_ptr.vmem [resolvable:$true] %s437_s25 }
  0x7c   : > { %s3560_s29 = scalar_lea.hbm %s3936_s14, 384  ;;  %p3566_p6 = scmp.lt.s32.totalorder %s3936_s14, %s4413_s7 }
  0x7d   : > { %p3561_p1 = scmp.ne.s32.totalorder %s3936_s14, %s3560_s29  ;;  %p3567_p7 = scmp.lt.s32.totalorder %s3565_s24, %s3560_s29 }
  0x7f   : > { %p3563_p2 = pnand %p3561_p1, %p3843_p5  ;;  %p3568_p11 = por %p3567_p7, %p3566_p6 }
  0x81   : > { %p3564_p3 = pneg %p3563_p2 }
  0x83   : > { %p3569_p4 = pnand %p3568_p11, %p3564_p3 }
  0x85   : > { %3572 = shalt.err (!%p3569_p4)
}
  0x86   : > { %s3573_s23 = scalar_lea.vmem %s438_s25, 384  ;;  %s3672_s20 = smov [#allocation9]  }
  0x87   : > { %p3574_p9 = scmp.ne.s32.totalorder %s438_s25, %s3573_s23  ;;  %s3578_s9 = sshll.u32 %s3672_s20, 4  ;;  %s3579_s9 = int_to_ptr.vmem [resolvable:$false] %s3578_s9 }
  0x88   : > { %s3580_s11 = scalar_lea.vmem %s3579_s9, 768  ;;  %p3581_p12 = scmp.lt.s32.totalorder %s438_s25, %s3579_s9 }
  0x89   : > { %p3576_p8 = pnand %p3574_p9, %p3843_p5  ;;  %p3582_p13 = scmp.lt.s32.totalorder %s3580_s11, %s3573_s23 }
  0x8b   : > { %p3577_p10 = pneg %p3576_p8  ;;  %p3583_p1 = por %p3582_p13, %p3581_p12 }
  0x8d   : > { %p3584_p2 = pnand %p3583_p1, %p3577_p10 }
  0x8f   : > { %3587 = shalt.err (!%p3584_p2)
}
  0x90   : > { %3224 = dma.hbm_to_vmem [thread:$0]  (!%p3811_p0), %s3936_s14, 384, %s438_s25, %s426_s22  }
  0x91   : > { %p4446_p3 = scmp.ne.s32.totalorder %s4437_s28, 0 }
  0x92   : > { %s448_s30 = sand.u32 (!%p4446_p3), 1, %s3654_s18   ;;  %p4447_p5 = scmp.ne.s32.totalorder (!%p4446_p3), %s4436_s27, 0 }
  0x93   : > { %446 = sbr.rel (%p4446_p3) target bundleno = 4878 (0x130e), region = 64  ;;  %s449_s16 = scalar_lea.sflag (!%p4446_p3), [#allocation4], %s448_s30 }
  0x94   : > { %s3190_s26 = smul.u32 (!%p4446_p3), 192, %s448_s30 }
  0x96   : > { %s3959_s4 = scalar_lea.vmem (!%p4446_p3), [#allocation3], %s3190_s26 }
  0x98   : > { %3629 = dma.done.wait (%p4447_p5), %s449_s16, 3072  }
  0x99   : > { %3631 = vsyncadd (%p4447_p5), %s449_s16, 4294964224  ;;  %s457_s15 = sand.u32 1, %s3763_s21   ;;  %s2805_s12 = sshll.u32 %s448_s30, 6 }
  0x9a   : > { %s458_s14 = scalar_lea.sflag [#allocation7], %s457_s15  ;;  %s3966_s25 = scalar_lea.vmem [#allocation6], %s2805_s12 }
  0x9b   : > { %3633 = dma.done.wait (%p4447_p5), %s458_s14, 3072  }
  0x9c   : > { %3635 = vsyncadd (%p4447_p5), %s458_s14, 4294964224  ;;  %s2806_s28 = sshll.u32 %s448_s30, 7  ;;  %s3191_s22 = smul.u32 24, %s448_s30 }
  0x9d   : > { %s3972_s29 = scalar_lea.vmem [#allocation8], %s2806_s28  ;;  %s476_s8 = scalar_lea.sflag [#allocation10], %s457_s15 }
  0x9e   : > { %s3974_s13 = scalar_lea.vmem [#allocation9], %s3191_s22 }
  0x9f   : > { %3637 = dma.done.wait (%p4447_p5), %s476_s8, 384  }
  0xa0   : > { %3639 = vsyncadd (%p4447_p5), %s476_s8, 4294966912  ;;  %p4448_p0 = scmp.eq.s32.totalorder %s3763_s21, 0 }
  0xa2   : > { %3641 = dma.done.wait (%p4448_p0), [#allocation10], 1024   ;;  %p4449_p6 = pmov %p4448_p0 }
  0xa3   : > { %p537_p7 = scmp.lt.s32.totalorder %s3763_s21, 1  ;;  %p4450_p11 = scmp.ne.s32.totalorder %s3763_s21, 0 }
  0xa4   : > { %3643 = vsyncadd (%p4449_p6), [#allocation10], 4294966272 }
  0xa5   : > { %s538_s24 = scalar_select %p537_p7, %s3763_s21, 1 }
  0xa6   : > { %546 = sbr.rel (%p4450_p11) target bundleno = 483 (0x1e3), region = 88 }
  0xa7   : > { %s2919_s19 = sshll.u32 %s538_s24, 7 }
  0xa8   : > { %s3989_s20 = scalar_lea.vmem %s4411_s5, %s2919_s19 }
  0xab   : > { %v547_v0 = vld [vmem:[%s4406_s0] sm:$0xff]  ;;  %v548_v1 = vld [vmem:[%s4406_s0 + $0x8] sm:$0xff] }
  0xac   : > { %551 = vadd.xlane.f32.xlu0 %v547_v0  ;;  %v2811_v17 = vld [vmem:[%s4408_s2] ss:$0 sm:$0xff]  ;;  %v2812_v19 = vld [vmem:[%s4408_s2 + $0x1] ss:$0 sm:$0xff] }
  0xb0   : > { %553 = vadd.xlane.f32.xlu0 %v548_v1 }
 0x135   : > { %v552_v2 = vpop.xlane.xlu0 %551 }
 0x136   : > { %v556_v3 = vmul.f32 0.0078125, %v552_v2 }
 0x138   : > { %v558_v4 = vsub.f32 %v547_v0, %v556_v3 }
 0x139   : > { %v554_v5 = vpop.xlane.xlu0 %553 }
 0x13a   : > { %v557_v6 = vmul.f32 0.0078125, %v554_v5  ;;  %v560_v7 = vmul.f32 %v558_v4, %v558_v4 }
 0x13c   : > { %v559_v8 = vsub.f32 %v548_v1, %v557_v6  ;;  %562 = vadd.xlane.f32.xlu1 %v560_v7 }
 0x13e   : > { %v561_v9 = vmul.f32 %v559_v8, %v559_v8 }
 0x140   : > { %564 = vadd.xlane.f32.xlu1 %v561_v9 }
 0x1c5   : > { %v563_v10 = vpop.xlane.xlu1 %562 }
 0x1c6   : > { %v566_v11 = vmul.f32 0.0078125, %v563_v10 }
 0x1c8   : > { %v568_v12 = vadd.f32 1e-05, %v566_v11 }
 0x1c9   : > { %v565_v13 = vpop.xlane.xlu1 %564 }
 0x1ca   : > { %3278 = vrsqrt.f32 %v568_v12  ;;  %v567_v14 = vmul.f32 0.0078125, %v565_v13 }
 0x1cc   : > { %v569_v15 = vadd.f32 1e-05, %v567_v14 }
 0x1ce   : > { %3280 = vrsqrt.f32 %v569_v15 }
 0x1d7   : > { %v3279_v16 = vpop.eup %3278 }
 0x1d8   : > { %v572_v18 = vmul.f32 %v3279_v16, %v558_v4 }
 0x1da   : > { %v578_v20 = vmul.f32 %v2811_v17, %v572_v18 }
 0x1db   : > { %v3281_v21 = vpop.eup %3280 }
 0x1dc   : > { %v584_v22 = vadd.f32 %v2812_v19, %v578_v20  ;;  %v573_v23 = vmul.f32 %v3281_v21, %v559_v8 }
 0x1de   : > { %586 = vst [vmem:[#allocation2] sm:$0xff] %v584_v22  ;;  %v579_v24 = vmul.f32 %v2811_v17, %v573_v23 }
 0x1e0   : > { %v585_v25 = vadd.f32 %v2812_v19, %v579_v24 }
 0x1e2   : > { %587 = vst [vmem:[#allocation2 + $0x8] sm:$0xff] %v585_v25 }
 0x1e3 PF: > { %v3297_v26 = vld [vmem:[%s3959_s4 + $0xac] ss:$12 sps:$4 sm:$0xff]   ;;  %v3299_v27 = vld [vmem:[%s3959_s4 + $0xa8] ss:$12 sps:$4 sm:$0xff]   ;;  %v3673_v28 = vmov 0   ;;  %v3674_v29 = vmov 0.0   ;;  %v626_v55 = vlaneseq }
 0x1e4   : > { %798 = vmatprep.mubr.bf16.mxu0 %v3673_v28  ;;  %3010 = vmatprep.subr.bf16.mxu1 %v3674_v29  ;;  %v3300_v30 = vld [vmem:[%s3959_s4 + $0x94] ss:$12 sps:$4 sm:$0xff]   ;;  %v3302_v31 = vld [vmem:[%s3959_s4 + $0x90] ss:$12 sps:$4 sm:$0xff]   ;;  %v3305_v33 = vld [vmem:[%s3959_s4 + $0x78] ss:$12 sps:$4 sm:$0xff]  }
 0x1e5   : > { %766 = vmatprep.subr.bf16.mxu0 %v3297_v26  ;;  %v3303_v32 = vld [vmem:[%s3959_s4 + $0x7c] ss:$12 sps:$4 sm:$0xff]   ;;  %v3306_v34 = vld [vmem:[%s3959_s4 + $0x64] ss:$12 sps:$4 sm:$0xff]   ;;  %v3308_v35 = vld [vmem:[%s3959_s4 + $0x60] ss:$12 sps:$4 sm:$0xff]  }
 0x1e6   : > { %767 = vmatpush1.bf16.msra.mxu0 %v3299_v27  ;;  %v3309_v36 = vld [vmem:[%s3959_s4 + $0x4c] ss:$12 sps:$4 sm:$0xff]   ;;  %v3321_v37 = vld [vmem:[%s3959_s4 + $0xb0] ss:$12 sps:$4 sm:$0xff]   ;;  %v3311_v39 = vld [vmem:[%s3959_s4 + $0x48] ss:$12 sps:$4 sm:$0xff]  }
 0x1e7   : > { %768 = vmatprep.subr.bf16.mxu0 %v3300_v30  ;;  %3011 = vmatpush3.bf16.msra.mxu1 %v3321_v37  ;;  %v3322_v38 = vld [vmem:[%s3959_s4 + $0x98] ss:$12 sps:$4 sm:$0xff]   ;;  %v3312_v40 = vld [vmem:[%s3959_s4 + $0x34] ss:$12 sps:$4 sm:$0xff]   ;;  %v3314_v42 = vld [vmem:[%s3959_s4 + $0x30] ss:$12 sps:$4 sm:$0xff]  }
 0x1e8   : > { %3012 = vmatprep.subr.bf16.mxu1 %v3674_v29  ;;  %v3323_v41 = vld [vmem:[%s3959_s4 + $0x80] ss:$12 sps:$4 sm:$0xff]   ;;  %v3315_v43 = vld [vmem:[%s3959_s4 + $0x1c] ss:$12 sps:$4 sm:$0xff]   ;;  %v3317_v45 = vld [vmem:[%s3959_s4 + $0x18] ss:$12 sps:$4 sm:$0xff]  }
 0x1e9   : > { %v3324_v44 = vld [vmem:[%s3959_s4 + $0x68] ss:$12 sps:$4 sm:$0xff]   ;;  %v3318_v46 = vld [vmem:[%s3959_s4 + $0x4] ss:$12 sps:$4 sm:$0xff]   ;;  %v3320_v48 = vld [vmem:[%s3959_s4] ss:$12 sps:$4 sm:$0xff]  }
 0x1ea   : > { %769 = vmatpush1.bf16.msra.mxu0 %v3302_v31  ;;  %v3325_v47 = vld [vmem:[%s3959_s4 + $0x50] ss:$12 sps:$4 sm:$0xff]   ;;  %v3326_v51 = vld [vmem:[%s3959_s4 + $0x38] ss:$12 sps:$4 sm:$0xff]   ;;  %v3327_v53 = vld [vmem:[%s3959_s4 + $0x20] ss:$12 sps:$4 sm:$0xff]  }
 0x1eb   : > { %770 = vmatprep.subr.bf16.mxu0 %v3303_v32  ;;  %3013 = vmatpush3.bf16.msra.mxu1 %v3322_v38  ;;  %v4031_v49 = vld [vmem:[#allocation2] sm:$0xff]  ;;  %v4033_v50 = vld [vmem:[#allocation2 + $0x8] sm:$0xff]  ;;  %vm3675_vm0 = vmmov 0   ;;  %v4052_v56 = vshrl.u32 %v626_v55, 7  ;;  %v4055_v57 = vld [vmem:[%s3974_s13 + $0x8] sm:$0xff]  ;;  %vm892_vm1 = vcmask 261120  }
 0x1ec   : > { %3014 = vmatprep.subr.bf16.mxu1 %v3674_v29  ;;  %v593_v52 = vpack.c.bf16 %v4033_v50, %v4031_v49  ;;  %v3328_v54 = vld [vmem:[%s3959_s4 + $0x8] ss:$12 sps:$4 sm:$0xff]   ;;  %3026 = vmatprep.mubr.msk.bf16.mxu1 %vm3675_vm0, %v3674_v29  ;;  %v4059_v59 = vld [vmem:[%s3974_s13] sm:$0xff]  ;;  %vm1013_vm2 = vcmask 1043456   ;;  %v3676_v24 = vmov 1966171168  }
 0x1ed   : > { %v628_v58 = vsub.s32 0, %v4052_v56  ;;  %v590_v14 = vld [vmem:[%s3974_s13 + $0x10] sm:$0xff]  ;;  %v861_v25 = vunpack.c.l.s4 %v3676_v24  ;;  %vm985_vm3 = vcmask 64512   ;;  %s3677_s28 = smov 96   ;;  %s3678_s22 = smov 64   ;;  %vm1795_vm4 = vcmask 523264  }
 0x1ee   : > { %771 = vmatpush1.bf16.msra.mxu0 %v3305_v33  ;;  %v2837_v30 = vld.sshfl [vmem:[%s4407_s1] sm:$0x11 pattern:$0x75316420]  ;;  %s3679_s8 = smov 32   ;;  %vm1798_vm5 = vcmask 785408  }
 0x1ef   : > { %772 = vmatprep.subr.bf16.mxu0 %v3306_v34  ;;  %3015 = vmatpush3.bf16.msra.mxu1 %v3323_v41  ;;  %v633_v60 = vrot.slane %v4055_v57, %v628_v58  ;;  %v629_v62 = vrot.slane %v4059_v59, %v628_v58  ;;  %v637_v15 = vrot.slane %v590_v14, %v628_v58  ;;  %v862_v26 = vunpack.c.0.s8 %v861_v25  ;;  %p2894_p4 = scmp.ne.s32.totalorder %s3763_s21, 1 }
 0x1f0   : > { %3016 = vmatprep.subr.bf16.mxu1 %v3674_v29  ;;  %v859_v33 = vcombine.high %v2837_v30, %v2837_v30 }
 0x1f1   : > { %v865_v27 = vsub.s32 %v862_v26, %v4052_v56 }
 0x1f2   : > { %773 = vmatpush1.bf16.msra.mxu0 %v3308_v35 }
 0x1f3   : > { %774 = vmatprep.subr.bf16.mxu0 %v3309_v36  ;;  %3017 = vmatpush3.bf16.msra.mxu1 %v3324_v44  ;;  %v866_v31 = vrot.slane %v2837_v30, %v865_v27  ;;  %v873_v36 = vrot.slane %v859_v33, %v865_v27 }
 0x1f4   : > { %3018 = vmatprep.subr.bf16.mxu1 %v3674_v29 }
 0x1f5   : > { %v4095_v32 = vrot.slane %v866_v31, %v628_v58 }
 0x1f6   : > { %775 = vmatpush1.bf16.msra.mxu0 %v3311_v39 }
 0x1f7   : > { %776 = vmatprep.subr.bf16.mxu0 %v3312_v40  ;;  %3019 = vmatpush3.bf16.msra.mxu1 %v3325_v47  ;;  %v4099_v40 = vrot.slane %v873_v36, %v628_v58 }
 0x1f8   : > { %3020 = vmatprep.subr.bf16.mxu1 %v3674_v29 }
 0x1fa   : > { %777 = vmatpush1.bf16.msra.mxu0 %v3314_v42 }
 0x1fb   : > { %778 = vmatprep.subr.bf16.mxu0 %v3315_v43  ;;  %3021 = vmatpush3.bf16.msra.mxu1 %v3326_v51 }
 0x1fc   : > { %3022 = vmatprep.subr.bf16.mxu1 %v3674_v29 }
 0x1fe   : > { %779 = vmatpush1.bf16.msra.mxu0 %v3317_v45 }
 0x1ff   : > { %780 = vmatprep.subr.bf16.mxu0 %v3318_v46  ;;  %3023 = vmatpush3.bf16.msra.mxu1 %v3327_v53 }
 0x200   : > { %3024 = vmatprep.subr.bf16.mxu1 %v3674_v29 }
 0x202   : > { %781 = vmatpush1.bf16.msra.mxu0 %v3320_v48 }
 0x203   : > { %3054 = vmatprep.subr.bf16.mxu0 %v3674_v29  ;;  %3025 = vmatpush3.bf16.msra.mxu1 %v3328_v54 }
 0x204   : > { %3030 = vmatprep.subr.bf16.mxu1 %v3674_v29 }
 0x205   : > { %799 = vmatmul.mubr.bf16.vlgmr.msra.gmra.mxu0 %v593_v52 }
 0x206   : > { %3056 = vmatprep.mubr.msk.bf16.mxu0 %vm3675_vm0, %v3674_v29  ;;  %3027 = vmatmul.mubr.bf16.vlgmr.msra.gmra.mxu1 %v593_v52 }
 0x207   : > { %3032 = vmatprep.mubr.msk.bf16.mxu1 %vm3675_vm0, %v3674_v29 }
 0x2c5   : > { %v800_v61 = vpop.f32.mrf.mxu0 }
 0x2c6   : > { %v801_v2 = vadd.f32 %v800_v61, %v629_v62  ;;  %v843_v16 = vpop.f32.mrf.mxu1 }
 0x2c7   : > { %v802_v63 = vpop.f32.mrf.mxu0  ;;  %v844_v17 = vadd.f32 %v843_v16, %v637_v15 }
 0x2c8   : > { %v803_v0 = vadd.f32 %v802_v63, %v633_v60  ;;  %v874_v7 = vmul.f32 0.17677669, %v801_v2  ;;  %v3028_v18 = vpop.f32.mrf.mxu1 }
 0x2c9   : > { %v804_v1 = vpop.f32.mrf.mxu0  ;;  %v4086_v19 = vpack.c.bf16 %v844_v17, %v844_v17 }
 0x2ca   : > { %v4063_v3 = vpack.c.bf16 %v803_v0, %v803_v0  ;;  %v4070_v9 = vpack.c.bf16 %v874_v7, %v874_v7  ;;  %v805_v10 = vadd.f32 %v804_v1, %v629_v62  ;;  %v846_v20 = vpop.f32.mrf.mxu1 }
 0x2cb   : > { %v806_v4 = vpop.f32.mrf.mxu0  ;;  %v847_v21 = vadd.f32 %v846_v20, %v637_v15  ;;  %v1015_v22 = vsel %vm1013_vm2, %v4086_v19, 0 }
 0x2cc   : > { %v807_v5 = vadd.f32 %v806_v4, %v633_v60  ;;  %v897_v6 = vsel %vm892_vm1, %v4063_v3, 0  ;;  %v875_v12 = vmul.f32 0.17677669, %v805_v10  ;;  %v3029_v23 = vpop.f32.mrf.mxu1 }
 0x2cd   : > { %3031 = vmatpush3.bf16.xpose.msra.mxu1 %v897_v6  ;;  %v4115_v4 = vpack.c.bf16 %v847_v21, %v847_v21 }
 0x2ce   : > { %3036 = vmatprep.subr.bf16.mxu1 %v3674_v29  ;;  %v4068_v8 = vpack.c.bf16 %v807_v5, %v807_v5  ;;  %v4079_v13 = vpack.c.bf16 %v875_v12, %v875_v12 }
 0x2cf   : > { %v1061_v7 = vsel %vm1013_vm2, %v4115_v4, 0 }
 0x2d0   : > { %v943_v11 = vsel %vm892_vm1, %v4068_v8, 0 }
 0x2d4   : > { %3033 = vmatmul.mubr.msk.bf16.vlgmr.msra.gmra.mxu1 %vm892_vm1, %v4070_v9 }
 0x2d5   : > { %3037 = vmatpush3.bf16.xpose.msra.mxu1 %v943_v11  ;;  %3038 = vmatprep.mubr.msk.bf16.mxu1 %vm3675_vm0, %v3674_v29 }
 0x2d6   : > { %3042 = vmatprep.subr.bf16.mxu1 %v3674_v29 }
 0x2dc   : > { %3039 = vmatmul.mubr.msk.bf16.vlgmr.msra.gmra.mxu1 %vm892_vm1, %v4079_v13 }
 0x2dd   : > { %3044 = vmatprep.mubr.msk.bf16.mxu1 %vm3675_vm0, %v3674_v29  ;;  %3043 = vmatpush3.bf16.msra.mxu1 %v1015_v22 }
 0x2de   : > { %3048 = vmatprep.subr.bf16.mxu1 %v3674_v29 }
 0x394   : > { %v933_v34 = vpop.f32.mrf.mxu1 }
 0x395   : > { %v934_v35 = vadd.f32 %v933_v34, %v4095_v32 }
 0x396   : > { %v3034_v37 = vpop.f32.mrf.mxu1 }
 0x397   : > { %v986_v38 = vsel %vm985_vm3, %v934_v35, -inf }
 0x398   : > { %987 = vmax.xlane.f32.xlu0 %v986_v38  ;;  %v936_v39 = vpop.f32.mrf.mxu1 }
 0x39a   : > { %v3035_v41 = vpop.f32.mrf.mxu1 }
 0x39c   : > { %v979_v42 = vpop.f32.mrf.mxu1 }
 0x39d   : > { %v980_v43 = vadd.f32 %v979_v42, %v4099_v40 }
 0x39e   : > { %v3040_v44 = vpop.f32.mrf.mxu1 }
 0x39f   : > { %v989_v45 = vsel %vm985_vm3, %v980_v43, -inf }
 0x3a0   : > { %990 = vmax.xlane.f32.xlu0 %v989_v45  ;;  %v982_v46 = vpop.f32.mrf.mxu1 }
 0x3a2   : > { %v3041_v47 = vpop.f32.mrf.mxu1 }
 0x3b6   : > { %1107 = vrot.lane.b32.xlu0 %v4063_v3, %s3677_s28 }
 0x421   : > { %v988_v48 = vpop.xlane.xlu0 %987 }
 0x422   : > { %v992_v51 = vsub.f32 %v934_v35, %v988_v48 }
 0x424   : > { %v994_v52 = vmul.f32 1.442695, %v992_v51 }
 0x426   : > { %3377 = vpow2.f32 %v994_v52 }
 0x429   : > { %v991_v53 = vpop.xlane.xlu0 %990 }
 0x42a   : > { %v993_v61 = vsub.f32 %v980_v43, %v991_v53 }
 0x42c   : > { %v996_v62 = vmul.f32 1.442695, %v993_v61 }
 0x42d   : > { %v1108_v54 = vpop.permute.xlu0 %1107 }
 0x42e   : > { %v1113_v55 = vsel %vm892_vm1, %v1108_v54, 0  ;;  %3379 = vpow2.f32 %v996_v62 }
 0x42f   : > { %3055 = vmatpush3.bf16.xpose.msra.mxu0 %v1113_v55 }
 0x430   : > { %3066 = vmatprep.subr.bf16.mxu0 %v3674_v29 }
 0x433   : > { %v3378_v58 = vpop.eup %3377 }
 0x434   : > { %v998_v60 = vsel %vm985_vm3, %v3378_v58, 0.0 }
 0x435   : > { %999 = vadd.xlane.f32.xlu1 %v998_v60 }
 0x43b   : > { %v3380_v63 = vpop.eup %3379 }
 0x43c   : > { %v1001_v0 = vsel %vm985_vm3, %v3380_v63, 0.0 }
 0x446   : > { %1159 = vrot.lane.b32.xlu1 %v4068_v8, %s3677_s28 }
 0x46a   : > { %1002 = vadd.xlane.f32.xlu1 %v1001_v0 }
 0x47b   : > { %1104 = vrot.lane.b32.xlu1 %v4070_v9, %s3677_s28 }
 0x47f   : > { %1156 = vrot.lane.b32.xlu1 %v4079_v13, %s3677_s28 }
 0x4be   : > { %v1000_v1 = vpop.xlane.xlu1 %999 }
 0x4bf   : > { %3381 = vrcp.f32 %v1000_v1 }
 0x4c2   : > { %v1160_v10 = vpop.permute.xlu1 %1159 }
 0x4c3   : > { %v1165_v17 = vsel %vm892_vm1, %v1160_v10, 0 }
 0x4cc   : > { %v3382_v2 = vpop.eup %3381 }
 0x4cd   : > { %v1006_v5 = vmul.f32 %v3382_v2, %v3378_v58 }
 0x4cf   : > { %v1008_v6 = vpack.c.bf16 %v1006_v5, %v1006_v5 }
 0x4d1   : > { %3045 = vmatmul.mubr.msk.bf16.vlgmr.msra.gmra.mxu1 %vm985_vm3, %v1008_v6 }
 0x4d2   : > { %3049 = vmatpush3.bf16.msra.mxu1 %v1061_v7  ;;  %3050 = vmatprep.mubr.msk.bf16.mxu1 %vm3675_vm0, %v3674_v29 }
 0x4d3   : > { %3060 = vmatprep.subr.bf16.mxu1 %v3674_v29 }
 0x4f3   : > { %v1003_v11 = vpop.xlane.xlu1 %1002 }
 0x4f4   : > { %3383 = vrcp.f32 %v1003_v11 }
 0x4f7   : > { %v1105_v12 = vpop.permute.xlu1 %1104 }
 0x4f8   : > { %3057 = vmatmul.mubr.msk.bf16.vlgmr.msra.gmra.mxu0 %vm892_vm1, %v1105_v12 }
 0x4f9   : > { %3068 = vmatprep.mubr.msk.bf16.mxu0 %vm3675_vm0, %v3674_v29 }
 0x4fb   : > { %v1157_v18 = vpop.permute.xlu1 %1156 }
 0x501   : > { %v3384_v14 = vpop.eup %3383 }
 0x502   : > { %v1007_v15 = vmul.f32 %v3384_v14, %v3380_v63 }
 0x504   : > { %v1009_v16 = vpack.c.bf16 %v1007_v15, %v1007_v15 }
 0x506   : > { %3051 = vmatmul.mubr.msk.bf16.vlgmr.msra.gmra.mxu1 %vm985_vm3, %v1009_v16 }
 0x507   : > { %3061 = vmatpush3.bf16.xpose.msra.mxu1 %v1165_v17  ;;  %3062 = vmatprep.mubr.msk.bf16.mxu1 %vm3675_vm0, %v3674_v29 }
 0x508   : > { %3072 = vmatprep.subr.bf16.mxu1 %v3674_v29 }
 0x50e   : > { %3063 = vmatmul.mubr.msk.bf16.vlgmr.msra.gmra.mxu1 %vm892_vm1, %v1157_v18 }
 0x50f   : > { %3074 = vmatprep.mubr.msk.bf16.mxu1 %vm3675_vm0, %v3674_v29 }
 0x591   : > { %v4134_v20 = vpop.f32.mrf.mxu1 }
 0x593   : > { %v3046_v21 = vpop.f32.mrf.mxu1 }
 0x595   : > { %v1054_v22 = vpop.f32.mrf.mxu1 }
 0x597   : > { %v3047_v23 = vpop.f32.mrf.mxu1 }
 0x5b8   : > { %v1149_v24 = vpop.f32.mrf.mxu0 }
 0x5b9   : > { %v1150_v25 = vadd.f32 %v1149_v24, %v4095_v32 }
 0x5ba   : > { %v3058_v26 = vpop.f32.mrf.mxu0 }
 0x5bb   : > { %v1207_v27 = vsel %vm985_vm3, %v1150_v25, -inf }
 0x5bc   : > { %1208 = vmax.xlane.f32.xlu0 %v1207_v27  ;;  %v1152_v30 = vpop.f32.mrf.mxu0 }
 0x5be   : > { %v3059_v31 = vpop.f32.mrf.mxu0 }
 0x5c6   : > { %v4138_v33 = vpop.f32.mrf.mxu1 }
 0x5c8   : > { %v3052_v34 = vpop.f32.mrf.mxu1 }
 0x5ca   : > { %v1100_v35 = vpop.f32.mrf.mxu1 }
 0x5cc   : > { %v3053_v36 = vpop.f32.mrf.mxu1 }
 0x5ce   : > { %v1201_v37 = vpop.f32.mrf.mxu1 }
 0x5cf   : > { %v1202_v38 = vadd.f32 %v1201_v37, %v4099_v40 }
 0x5d0   : > { %v3064_v39 = vpop.f32.mrf.mxu1 }
 0x5d1   : > { %v1210_v41 = vsel %vm985_vm3, %v1202_v38, -inf }
 0x5d2   : > { %1211 = vmax.xlane.f32.xlu1 %v1210_v41  ;;  %v1204_v42 = vpop.f32.mrf.mxu1 }
 0x5d4   : > { %v3065_v43 = vpop.f32.mrf.mxu1 }
 0x5e3   : > { %1281 = vrot.lane.b32.xlu1 %v4115_v4, %s3677_s28 }
 0x5e7   : > { %1331 = vrot.lane.b32.xlu1 %v4063_v3, %s3678_s22 }
 0x5eb   : > { %1381 = vrot.lane.b32.xlu1 %v4068_v8, %s3678_s22 }
 0x5ef   : > { %1379 = vrot.lane.b32.xlu1 %v4079_v13, %s3678_s22 }
 0x645   : > { %v1209_v44 = vpop.xlane.xlu0 %1208 }
 0x646   : > { %v1213_v45 = vsub.f32 %v1150_v25, %v1209_v44 }
 0x648   : > { %v1215_v46 = vmul.f32 1.442695, %v1213_v45 }
 0x64a   : > { %3385 = vpow2.f32 %v1215_v46 }
 0x657   : > { %v3386_v47 = vpop.eup %3385 }
 0x658   : > { %v1219_v48 = vsel %vm985_vm3, %v3386_v47, 0.0 }
 0x659   : > { %1220 = vadd.xlane.f32.xlu0 %v1219_v48 }
 0x65b   : > { %v1212_v51 = vpop.xlane.xlu1 %1211 }
 0x65c   : > { %v1214_v52 = vsub.f32 %v1202_v38, %v1212_v51 }
 0x65e   : > { %v1217_v53 = vmul.f32 1.442695, %v1214_v52 }
 0x65f   : > { %v1282_v54 = vpop.permute.xlu1 %1281 }
 0x660   : > { %3387 = vpow2.f32 %v1217_v53  ;;  %v1287_v55 = vsel %vm1013_vm2, %v1282_v54, 0 }
 0x661   : > { %3073 = vmatpush3.bf16.msra.mxu1 %v1287_v55 }
 0x662   : > { %3084 = vmatprep.subr.bf16.mxu1 %v3674_v29 }
 0x663   : > { %v1332_v5 = vpop.permute.xlu1 %1331 }
 0x664   : > { %v1337_v7 = vsel %vm892_vm1, %v1332_v5, 0 }
 0x667   : > { %v1382_v12 = vpop.permute.xlu1 %1381 }
 0x668   : > { %v1387_v16 = vsel %vm892_vm1, %v1382_v12, 0 }
 0x66b   : > { %v1380_v17 = vpop.permute.xlu1 %1379 }
 0x66d   : > { %v3388_v58 = vpop.eup %3387 }
 0x66e   : > { %v1222_v60 = vsel %vm985_vm3, %v3388_v58, 0.0 }
 0x66f   : > { %1223 = vadd.xlane.f32.xlu0 %v1222_v60 }
 0x685   : > { %1232 = vrot.lane.b32.xlu0 %v4086_v19, %s3677_s28 }
 0x689   : > { %1329 = vrot.lane.b32.xlu0 %v4070_v9, %s3678_s22 }
 0x6e2   : > { %v1221_v61 = vpop.xlane.xlu0 %1220 }
 0x6e3   : > { %3389 = vrcp.f32 %v1221_v61 }
 0x6f0   : > { %v3390_v62 = vpop.eup %3389 }
 0x6f1   : > { %v1227_v0 = vmul.f32 %v3390_v62, %v3386_v47 }
 0x6f3   : > { %v1229_v6 = vpack.c.bf16 %v1227_v0, %v1227_v0 }
 0x6f8   : > { %v1224_v63 = vpop.xlane.xlu0 %1223 }
 0x6f9   : > { %3391 = vrcp.f32 %v1224_v63 }
 0x6fc   : > { %v1233_v1 = vpop.permute.xlu0 %1232 }
 0x6fd   : > { %v1238_v2 = vsel %vm1013_vm2, %v1233_v1, 0 }
 0x6fe   : > { %3067 = vmatpush3.bf16.msra.mxu0 %v1238_v2 }
 0x6ff   : > { %3078 = vmatprep.subr.bf16.mxu0 %v3674_v29 }
 0x700   : > { %v1330_v14 = vpop.permute.xlu0 %1329 }
 0x701   : > { %3069 = vmatmul.mubr.msk.bf16.vlgmr.msra.gmra.mxu0 %vm985_vm3, %v1229_v6 }
 0x702   : > { %3079 = vmatpush3.bf16.xpose.msra.mxu0 %v1337_v7  ;;  %3080 = vmatprep.mubr.msk.bf16.mxu0 %vm3675_vm0, %v3674_v29 }
 0x703   : > { %3090 = vmatprep.subr.bf16.mxu0 %v3674_v29 }
 0x706   : > { %v3392_v10 = vpop.eup %3391 }
 0x707   : > { %v1228_v11 = vmul.f32 %v3392_v10, %v3388_v58 }
 0x709   : > { %3081 = vmatmul.mubr.msk.bf16.vlgmr.msra.gmra.mxu0 %vm892_vm1, %v1330_v14  ;;  %v1230_v15 = vpack.c.bf16 %v1228_v11, %v1228_v11 }
 0x70a   : > { %3092 = vmatprep.mubr.msk.bf16.mxu0 %vm3675_vm0, %v3674_v29 }
 0x70b   : > { %3075 = vmatmul.mubr.msk.bf16.vlgmr.msra.gmra.mxu1 %vm985_vm3, %v1230_v15 }
 0x70c   : > { %3085 = vmatpush3.bf16.xpose.msra.mxu1 %v1387_v16  ;;  %3086 = vmatprep.mubr.msk.bf16.mxu1 %vm3675_vm0, %v3674_v29 }
 0x70d   : > { %3096 = vmatprep.subr.bf16.mxu1 %v3674_v29 }
 0x713   : > { %3087 = vmatmul.mubr.msk.bf16.vlgmr.msra.gmra.mxu1 %vm892_vm1, %v1380_v17 }
 0x714   : > { %3098 = vmatprep.mubr.msk.bf16.mxu1 %vm3675_vm0, %v3674_v29 }
 0x7c1   : > { %v4176_v18 = vpop.f32.mrf.mxu0 }
 0x7c3   : > { %v3070_v21 = vpop.f32.mrf.mxu0 }
 0x7c5   : > { %v1277_v22 = vpop.f32.mrf.mxu0 }
 0x7c7   : > { %v3071_v23 = vpop.f32.mrf.mxu0 }
 0x7c9   : > { %v1373_v24 = vpop.f32.mrf.mxu0 }
 0x7ca   : > { %v1374_v25 = vadd.f32 %v1373_v24, %v4095_v32 }
 0x7cb   : > { %v4179_v26 = vpop.f32.mrf.mxu1  ;;  %v3082_v27 = vpop.f32.mrf.mxu0 }
 0x7cc   : > { %v3282_v30 = vpack.i.bf16 %v4179_v26, %v4176_v18  ;;  %v1429_v31 = vsel %vm985_vm3, %v1374_v25, -inf }
 0x7cd   : > { %1430 = vmax.xlane.f32.xlu0 %v1429_v31  ;;  %v3076_v34 = vpop.f32.mrf.mxu1  ;;  %v1376_v35 = vpop.f32.mrf.mxu0 }
 0x7cf   : > { %v1326_v36 = vpop.f32.mrf.mxu1  ;;  %v3083_v37 = vpop.f32.mrf.mxu0 }
 0x7d1   : > { %v3077_v38 = vpop.f32.mrf.mxu1 }
 0x7d3   : > { %v1423_v39 = vpop.f32.mrf.mxu1 }
 0x7d4   : > { %v1424_v41 = vadd.f32 %v1423_v39, %v4099_v40 }
 0x7d5   : > { %v3088_v42 = vpop.f32.mrf.mxu1 }
 0x7d6   : > { %v1432_v43 = vsel %vm985_vm3, %v1424_v41, -inf }
 0x7d7   : > { %1433 = vmax.xlane.f32.xlu1 %v1432_v43  ;;  %v1426_v44 = vpop.f32.mrf.mxu1 }
 0x7d9   : > { %v3089_v45 = vpop.f32.mrf.mxu1 }
 0x7e8   : > { %1501 = vrot.lane.b32.xlu1 %v4115_v4, %s3678_s22 }
 0x7ec   : > { %1551 = vrot.lane.b32.xlu1 %v4063_v3, %s3679_s8 }
 0x7f0   : > { %1601 = vrot.lane.b32.xlu1 %v4068_v8, %s3679_s8 }
 0x7f4   : > { %1599 = vrot.lane.b32.xlu1 %v4079_v13, %s3679_s8 }
 0x856   : > { %v1431_v46 = vpop.xlane.xlu0 %1430 }
 0x857   : > { %v1435_v47 = vsub.f32 %v1374_v25, %v1431_v46 }
 0x859   : > { %v1437_v48 = vmul.f32 1.442695, %v1435_v47 }
 0x85b   : > { %3393 = vpow2.f32 %v1437_v48 }
 0x860   : > { %v1434_v51 = vpop.xlane.xlu1 %1433 }
 0x861   : > { %v1436_v52 = vsub.f32 %v1424_v41, %v1434_v51 }
 0x863   : > { %v1439_v53 = vmul.f32 1.442695, %v1436_v52 }
 0x864   : > { %v1502_v54 = vpop.permute.xlu1 %1501 }
 0x865   : > { %3395 = vpow2.f32 %v1439_v53  ;;  %v1507_v55 = vsel %vm1013_vm2, %v1502_v54, 0 }
 0x866   : > { %3097 = vmatpush3.bf16.msra.mxu1 %v1507_v55 }
 0x867   : > { %3108 = vmatprep.subr.bf16.mxu1 %v3674_v29 }
 0x868   : > { %v3394_v3 = vpop.eup %3393  ;;  %v1552_v2 = vpop.permute.xlu1 %1551 }
 0x869   : > { %v1441_v8 = vsel %vm985_vm3, %v3394_v3, 0.0  ;;  %v1557_v6 = vsel %vm892_vm1, %v1552_v2, 0  ;;  %v3331_v2 = vld [vmem:[%s3966_s25 + $0x28] sm:$0xff]  }
 0x86a   : > { %1442 = vadd.xlane.f32.xlu0 %v1441_v8 }
 0x86c   : > { %v1602_v10 = vpop.permute.xlu1 %1601 }
 0x86d   : > { %v1607_v14 = vsel %vm892_vm1, %v1602_v10, 0  ;;  %v3336_v10 = vld [vmem:[%s3966_s25] sm:$0xff]  }
 0x870   : > { %v1600_v15 = vpop.permute.xlu1 %1599 }
 0x872   : > { %v3396_v58 = vpop.eup %3395 }
 0x873   : > { %v1444_v13 = vsel %vm985_vm3, %v3396_v58, 0.0 }
 0x874   : > { %1445 = vadd.xlane.f32.xlu0 %v1444_v13 }
 0x88a   : > { %1453 = vrot.lane.b32.xlu0 %v4086_v19, %s3678_s22 }
 0x88e   : > { %1549 = vrot.lane.b32.xlu0 %v4070_v9, %s3679_s8 }
 0x8f3   : > { %v1443_v60 = vpop.xlane.xlu0 %1442 }
 0x8f4   : > { %3397 = vrcp.f32 %v1443_v60 }
 0x8fd   : > { %v1446_v61 = vpop.xlane.xlu0 %1445 }
 0x8fe   : > { %3399 = vrcp.f32 %v1446_v61 }
 0x901   : > { %v3398_v62 = vpop.eup %3397  ;;  %v1454_v63 = vpop.permute.xlu0 %1453 }
 0x902   : > { %v1459_v0 = vsel %vm1013_vm2, %v1454_v63, 0  ;;  %v1449_v1 = vmul.f32 %v3398_v62, %v3394_v3 }
 0x903   : > { %3091 = vmatpush3.bf16.msra.mxu0 %v1459_v0  ;;  %v3329_v0 = vld [vmem:[%s3966_s25 + $0x38] sm:$0xff]  }
 0x904   : > { %v1451_v5 = vpack.c.bf16 %v1449_v1, %v1449_v1  ;;  %3102 = vmatprep.subr.bf16.mxu0 %v3674_v29  ;;  %v3330_v1 = vld [vmem:[%s3966_s25 + $0x30] sm:$0xff]  }
 0x905   : > { %v1550_v11 = vpop.permute.xlu0 %1549 }
 0x906   : > { %3093 = vmatmul.mubr.msk.bf16.vlgmr.msra.gmra.mxu0 %vm985_vm3, %v1451_v5  ;;  %v3332_v5 = vld [vmem:[%s3966_s25 + $0x20] sm:$0xff]  }
 0x907   : > { %3103 = vmatpush3.bf16.xpose.msra.mxu0 %v1557_v6  ;;  %3104 = vmatprep.mubr.msk.bf16.mxu0 %vm3675_vm0, %v3674_v29  ;;  %v3333_v6 = vld [vmem:[%s3966_s25 + $0x18] sm:$0xff]  }
 0x908   : > { %3114 = vmatprep.subr.bf16.mxu0 %v3674_v29 }
 0x90b   : > { %v3400_v9 = vpop.eup %3399 }
 0x90c   : > { %v1450_v7 = vmul.f32 %v3400_v9, %v3396_v58  ;;  %v3335_v9 = vld [vmem:[%s3966_s25 + $0x8] sm:$0xff]  }
 0x90e   : > { %3105 = vmatmul.mubr.msk.bf16.vlgmr.msra.gmra.mxu0 %vm892_vm1, %v1550_v11  ;;  %v1452_v12 = vpack.c.bf16 %v1450_v7, %v1450_v7 }
 0x90f   : > { %3116 = vmatprep.mubr.msk.bf16.mxu0 %vm3675_vm0, %v3674_v29 }
 0x910   : > { %3099 = vmatmul.mubr.msk.bf16.vlgmr.msra.gmra.mxu1 %vm985_vm3, %v1452_v12 }
 0x911   : > { %3109 = vmatpush3.bf16.xpose.msra.mxu1 %v1607_v14  ;;  %3110 = vmatprep.mubr.msk.bf16.mxu1 %vm3675_vm0, %v3674_v29 }
 0x912   : > { %3120 = vmatprep.subr.bf16.mxu1 %v3674_v29 }
 0x918   : > { %3111 = vmatmul.mubr.msk.bf16.vlgmr.msra.gmra.mxu1 %vm892_vm1, %v1600_v15 }
 0x919   : > { %3122 = vmatprep.mubr.msk.bf16.mxu1 %vm3675_vm0, %v3674_v29 }
 0x9c6   : > { %v1495_v16 = vpop.f32.mrf.mxu0 }
 0x9c8   : > { %v3094_v17 = vpop.f32.mrf.mxu0 }
 0x9ca   : > { %v1498_v21 = vpop.f32.mrf.mxu0 }
 0x9cc   : > { %v3095_v22 = vpop.f32.mrf.mxu0 }
 0x9ce   : > { %v1593_v23 = vpop.f32.mrf.mxu0 }
 0x9cf   : > { %v1594_v24 = vadd.f32 %v1593_v23, %v4095_v32 }
 0x9d0   : > { %v1543_v25 = vpop.f32.mrf.mxu1  ;;  %v3106_v27 = vpop.f32.mrf.mxu0 }
 0x9d1   : > { %v1649_v31 = vsel %vm985_vm3, %v1594_v24, -inf  ;;  %v3287_v32 = vpack.i.bf16 %v1543_v25, %v1495_v16 }
 0x9d2   : > { %1650 = vmax.xlane.f32.xlu0 %v1649_v31  ;;  %v3100_v34 = vpop.f32.mrf.mxu1  ;;  %v1596_v35 = vpop.f32.mrf.mxu0 }
 0x9d4   : > { %v1546_v36 = vpop.f32.mrf.mxu1  ;;  %v3107_v37 = vpop.f32.mrf.mxu0 }
 0x9d6   : > { %v3101_v38 = vpop.f32.mrf.mxu1 }
 0x9d8   : > { %v1643_v39 = vpop.f32.mrf.mxu1 }
 0x9d9   : > { %v1644_v41 = vadd.f32 %v1643_v39, %v4099_v40 }
 0x9da   : > { %v3112_v42 = vpop.f32.mrf.mxu1 }
 0x9db   : > { %v1652_v43 = vsel %vm985_vm3, %v1644_v41, -inf }
 0x9dc   : > { %1653 = vmax.xlane.f32.xlu1 %v1652_v43  ;;  %v1646_v44 = vpop.f32.mrf.mxu1 }
 0x9de   : > { %v3113_v45 = vpop.f32.mrf.mxu1 }
 0x9df   : > { %v1820_v45 = vsub.s32 1, %v4052_v56 }
 0x9ed   : > { %1721 = vrot.lane.b32.xlu1 %v4115_v4, %s3679_s8 }
 0x9f1   : > { %3283 = vrot.lane.b32.xlu1 %v3282_v30, %s3679_s8 }
 0x9f5   : > { %3288 = vrot.lane.b32.xlu1 %v3287_v32, %s3678_s22  ;;  %v1821_v32 = vrot.slane %v4059_v59, %v1820_v45  ;;  %v3369_v45 = vld [vmem:[%s3972_s29 + $0x58] sm:$0xff]   ;;  %s4452_s22 = sld [smem:[#allocation23_spill]] (!%p2894_p4) }
 0xa5b   : > { %v1651_v46 = vpop.xlane.xlu0 %1650 }
 0xa5c   : > { %v1655_v47 = vsub.f32 %v1594_v24, %v1651_v46 }
 0xa5e   : > { %v1657_v40 = vmul.f32 1.442695, %v1655_v47 }
 0xa60   : > { %3401 = vpow2.f32 %v1657_v40 }
 0xa65   : > { %v1654_v48 = vpop.xlane.xlu1 %1653 }
 0xa66   : > { %v1656_v51 = vsub.f32 %v1644_v41, %v1654_v48 }
 0xa68   : > { %v1659_v52 = vmul.f32 1.442695, %v1656_v51 }
 0xa69   : > { %v1722_v53 = vpop.permute.xlu1 %1721 }
 0xa6a   : > { %3403 = vpow2.f32 %v1659_v52  ;;  %v1727_v54 = vsel %vm1013_vm2, %v1722_v53, 0  ;;  %v3337_v53 = vld [vmem:[%s3989_s20 + $0x70] ss:$8 sps:$4 sm:$0xff]  }
 0xa6b   : > { %3121 = vmatpush3.bf16.msra.mxu1 %v1727_v54  ;;  %v3339_v54 = vld [vmem:[%s3989_s20 + $0x74] ss:$8 sps:$4 sm:$0xff]  }
 0xa6c   : > { %2053 = vmatprep.subr.bf16.mxu1 %v3339_v54 }
 0xa6d   : > { %v3402_v4 = vpop.eup %3401  ;;  %v3284_v23 = vpop.permute.xlu1 %3283 }
 0xa6e   : > { %v1661_v55 = vsel %vm985_vm3, %v3402_v4, 0.0  ;;  %v3286_v25 = vunpack.i.h.bf16 %v3284_v23  ;;  %v3285_v27 = vunpack.i.l.bf16 %v3284_v23 }
 0xa6f   : > { %1662 = vadd.xlane.f32.xlu0 %v1661_v55 }
 0xa70   : > { %v1794_v35 = vsel %vm892_vm1, %v4138_v33, %v3286_v25  ;;  %v1793_v36 = vsel %vm892_vm1, %v4134_v20, %v3285_v27 }
 0xa71   : > { %v3289_v24 = vpop.permute.xlu1 %3288 }
 0xa72   : > { %v3291_v31 = vunpack.i.h.bf16 %v3289_v24  ;;  %v3290_v34 = vunpack.i.l.bf16 %v3289_v24 }
 0xa74   : > { %v1796_v39 = vsel %vm1795_vm4, %v1793_v36, %v3290_v34  ;;  %v1797_v41 = vsel %vm1795_vm4, %v1794_v35, %v3291_v31  ;;  %v3361_v36 = vld [vmem:[%s3972_s29 + $0x78] sm:$0xff]  }
 0xa77   : > { %v3404_v18 = vpop.eup %3403 }
 0xa78   : > { %v1664_v26 = vsel %vm985_vm3, %v3404_v18, 0.0 }
 0xa79   : > { %1665 = vadd.xlane.f32.xlu0 %v1664_v26 }
 0xa8f   : > { %1673 = vrot.lane.b32.xlu0 %v4086_v19, %s3679_s8 }
 0xaf8   : > { %v1663_v30 = vpop.xlane.xlu0 %1662 }
 0xaf9   : > { %3405 = vrcp.f32 %v1663_v30 }
 0xb02   : > { %v1666_v3 = vpop.xlane.xlu0 %1665 }
 0xb03   : > { %3407 = vrcp.f32 %v1666_v3 }
 0xb06   : > { %v3406_v8 = vpop.eup %3405  ;;  %v1674_v58 = vpop.permute.xlu0 %1673 }
 0xb07   : > { %v1679_v13 = vsel %vm1013_vm2, %v1674_v58, 0  ;;  %v1669_v60 = vmul.f32 %v3406_v8, %v3402_v4  ;;  %v3342_v8 = vld [vmem:[%s3989_s20 + $0x64] ss:$8 sps:$4 sm:$0xff]   ;;  %v3340_v58 = vld [vmem:[%s3989_s20 + $0x60] ss:$8 sps:$4 sm:$0xff]  }
 0xb08   : > { %3115 = vmatpush3.bf16.msra.mxu0 %v1679_v13  ;;  %v3345_v13 = vld [vmem:[%s3989_s20 + $0x54] ss:$8 sps:$4 sm:$0xff]  }
 0xb09   : > { %v1671_v61 = vpack.c.bf16 %v1669_v60, %v1669_v60  ;;  %3126 = vmatprep.subr.bf16.mxu0 %v3674_v29  ;;  %v3343_v60 = vld [vmem:[%s3989_s20 + $0x50] ss:$8 sps:$4 sm:$0xff]  }
 0xb0b   : > { %3117 = vmatmul.mubr.msk.bf16.vlgmr.msra.gmra.mxu0 %vm985_vm3, %v1671_v61  ;;  %v3346_v61 = vld [vmem:[%s3989_s20 + $0x40] ss:$8 sps:$4 sm:$0xff]  }
 0xb0c   : > { %3142 = vmatprep.mubr.msk.bf16.mxu0 %vm3675_vm0, %v3674_v29  ;;  %3127 = vmatpush3.bf16.msra.mxu0 %v3329_v0  ;;  %v3354_v0 = vld [vmem:[%s3989_s20 + $0x24] ss:$8 sps:$4 sm:$0xff]  }
 0xb0d   : > { %3128 = vmatprep.subr.bf16.mxu0 %v3674_v29 }
 0xb10   : > { %v3408_v19 = vpop.eup %3407  ;;  %3129 = vmatpush3.bf16.msra.mxu0 %v3330_v1  ;;  %v3352_v1 = vld [vmem:[%s3989_s20 + $0x20] ss:$8 sps:$4 sm:$0xff]  }
 0xb11   : > { %v1670_v62 = vmul.f32 %v3408_v19, %v3404_v18  ;;  %3130 = vmatprep.subr.bf16.mxu0 %v3674_v29  ;;  %v3348_v19 = vld [vmem:[%s3989_s20 + $0x44] ss:$8 sps:$4 sm:$0xff]  }
 0xb13   : > { %v1672_v63 = vpack.c.bf16 %v1670_v62, %v1670_v62  ;;  %v3351_v62 = vld [vmem:[%s3989_s20 + $0x34] ss:$8 sps:$4 sm:$0xff]  }
 0xb14   : > { %3131 = vmatpush3.bf16.msra.mxu0 %v3331_v2  ;;  %v3357_v2 = vld [vmem:[%s3989_s20 + $0x14] ss:$8 sps:$4 sm:$0xff]  }
 0xb15   : > { %3123 = vmatmul.mubr.msk.bf16.vlgmr.msra.gmra.mxu1 %vm985_vm3, %v1672_v63  ;;  %3132 = vmatprep.subr.bf16.mxu0 %v3674_v29  ;;  %v3349_v63 = vld [vmem:[%s3989_s20 + $0x30] ss:$8 sps:$4 sm:$0xff]  }
 0xb16   : > { %2085 = vmatprep.mubr.bf16.mxu1 %v3673_v28  ;;  %v3334_v28 = vld [vmem:[%s3966_s25 + $0x10] sm:$0xff]   ;;  %2054 = vmatpush1.bf16.msra.mxu1 %v3337_v53 }
 0xb17   : > { %2055 = vmatprep.subr.bf16.mxu1 %v3342_v8 }
 0xb18   : > { %3133 = vmatpush3.bf16.msra.mxu0 %v3332_v5  ;;  %v3355_v5 = vld [vmem:[%s3989_s20 + $0x10] ss:$8 sps:$4 sm:$0xff]  }
 0xb19   : > { %3134 = vmatprep.subr.bf16.mxu0 %v3674_v29 }
 0xb1a   : > { %2056 = vmatpush1.bf16.msra.mxu1 %v3340_v58 }
 0xb1b   : > { %2057 = vmatprep.subr.bf16.mxu1 %v3345_v13 }
 0xb1c   : > { %3135 = vmatpush3.bf16.msra.mxu0 %v3333_v6  ;;  %v3360_v6 = vld [vmem:[%s3989_s20 + $0x4] ss:$8 sps:$4 sm:$0xff]  }
 0xb1d   : > { %3136 = vmatprep.subr.bf16.mxu0 %v3674_v29 }
 0xb1e   : > { %2058 = vmatpush1.bf16.msra.mxu1 %v3343_v60 }
 0xb1f   : > { %2059 = vmatprep.subr.bf16.mxu1 %v3348_v19 }
 0xb20   : > { %3137 = vmatpush3.bf16.msra.mxu0 %v3334_v28  ;;  %v3358_v28 = vld [vmem:[%s3989_s20] ss:$8 sps:$4 sm:$0xff]  }
 0xb21   : > { %3138 = vmatprep.subr.bf16.mxu0 %v3674_v29 }
 0xb22   : > { %2060 = vmatpush1.bf16.msra.mxu1 %v3346_v61 }
 0xb23   : > { %2061 = vmatprep.subr.bf16.mxu1 %v3351_v62 }
 0xb24   : > { %3139 = vmatpush3.bf16.msra.mxu0 %v3335_v9 }
 0xb25   : > { %3140 = vmatprep.subr.bf16.mxu0 %v3674_v29 }
 0xb26   : > { %2062 = vmatpush1.bf16.msra.mxu1 %v3349_v63 }
 0xb27   : > { %2063 = vmatprep.subr.bf16.mxu1 %v3354_v0 }
 0xb28   : > { %3141 = vmatpush3.bf16.msra.mxu0 %v3336_v10 }
 0xb29   : > { %2970 = vmatprep.subr.bf16.mxu0 %v3361_v36 }
 0xb2a   : > { %2064 = vmatpush1.bf16.msra.mxu1 %v3352_v1 }
 0xb2b   : > { %2065 = vmatprep.subr.bf16.mxu1 %v3357_v2 }
 0xb2e   : > { %2066 = vmatpush1.bf16.msra.mxu1 %v3355_v5 }
 0xb2f   : > { %2067 = vmatprep.subr.bf16.mxu1 %v3360_v6 }
 0xb32   : > { %2068 = vmatpush1.bf16.msra.mxu1 %v3358_v28 }
 0xbcb   : > { %v1715_v7 = vpop.f32.mrf.mxu0 }
 0xbcd   : > { %v3118_v11 = vpop.f32.mrf.mxu0 }
 0xbcf   : > { %v1718_v12 = vpop.f32.mrf.mxu0 }
 0xbd1   : > { %v3119_v14 = vpop.f32.mrf.mxu0 }
 0xbd5   : > { %v1763_v15 = vpop.f32.mrf.mxu1 }
 0xbd6   : > { %v3292_v16 = vpack.i.bf16 %v1763_v15, %v1715_v7  ;;  %v1938_v15 = vsub.s32 4, %v4052_v56 }
 0xbd7   : > { %v3124_v17 = vpop.f32.mrf.mxu1 }
 0xbd8   : > { %3293 = vrot.lane.b32.xlu0 %v3292_v16, %s3677_s28 }
 0xbd9   : > { %v1766_v21 = vpop.f32.mrf.mxu1 }
 0xbda   : > { %v1939_v21 = vrot.slane %v4059_v59, %v1938_v15 }
 0xbdb   : > { %v3125_v22 = vpop.f32.mrf.mxu1 }
 0xbdc   : > { %v1944_v22 = vsub.s32 5, %v4052_v56 }
 0xbde   : > { %v1945_v27 = vrot.slane %v4059_v59, %v1944_v22 }
 0xc4a   : > { %v3294_v29 = vpop.permute.xlu0 %3293 }
 0xc4b   : > { %v3296_v37 = vunpack.i.h.bf16 %v3294_v29  ;;  %v3295_v38 = vunpack.i.l.bf16 %v3294_v29 }
 0xc4d   : > { %v1800_v42 = vsel %vm1798_vm5, %v1797_v41, %v3296_v37  ;;  %v1799_v43 = vsel %vm1798_vm5, %v1796_v39, %v3295_v38  ;;  %v3362_v37 = vld [vmem:[%s3972_s29 + $0x38] sm:$0xff]   ;;  %v3363_v38 = vld [vmem:[%s3972_s29 + $0x70] sm:$0xff]   ;;  %v3365_v41 = vld [vmem:[%s3972_s29 + $0x68] sm:$0xff]  }
 0xc4e   : > { %v1801_v44 = vpack.c.bf16 %v1800_v42, %v1799_v43  ;;  %v3364_v39 = vld [vmem:[%s3972_s29 + $0x30] sm:$0xff]   ;;  %v3366_v42 = vld [vmem:[%s3972_s29 + $0x28] sm:$0xff]   ;;  %v3367_v43 = vld [vmem:[%s3972_s29 + $0x60] sm:$0xff]  }
 0xc50   : > { %3143 = vmatmul.mubr.bf16.vlgmr.msra.gmra.mxu0 %v1801_v44  ;;  %v3368_v44 = vld [vmem:[%s3972_s29 + $0x20] sm:$0xff]  }
 0xc51   : > { %2971 = vmatpush3.bf16.msra.mxu0 %v3362_v37 }
 0xc52   : > { %2972 = vmatprep.subr.bf16.mxu0 %v3363_v38 }
 0xc55   : > { %2973 = vmatpush3.bf16.msra.mxu0 %v3364_v39 }
 0xc56   : > { %2974 = vmatprep.subr.bf16.mxu0 %v3365_v41 }
 0xc59   : > { %2975 = vmatpush3.bf16.msra.mxu0 %v3366_v42 }
 0xc5a   : > { %2976 = vmatprep.subr.bf16.mxu0 %v3367_v43 }
 0xc5d   : > { %2977 = vmatpush3.bf16.msra.mxu0 %v3368_v44 }
 0xc5e   : > { %2978 = vmatprep.subr.bf16.mxu0 %v3369_v45 }
 0xd10   : > { %v1904_v46 = vpop.f32.mrf.mxu0 }
 0xd11   : > { %v1905_v47 = vadd.f32 %v1904_v46, %v1821_v32  ;;  %v3371_v46 = vld [vmem:[%s3972_s29 + $0x50] sm:$0xff]  }
 0xd12   : > { %v3144_v33 = vpop.f32.mrf.mxu0 }
 0xd13   : > { %v1911_v40 = vadd.f32 %v1905_v47, %v4031_v49  ;;  %v3372_v47 = vld [vmem:[%s3972_s29 + $0x10] sm:$0xff]   ;;  %v3373_v33 = vld [vmem:[%s3972_s29 + $0x48] sm:$0xff]  }
 0xd14   : > { %v1907_v20 = vpop.f32.mrf.mxu0 }
 0xd15   : > { %v1908_v48 = vadd.f32 %v1907_v20, %v1821_v32  ;;  %1913 = vadd.xlane.f32.xlu1 %v1911_v40  ;;  %v3370_v32 = vld [vmem:[%s3972_s29 + $0x18] sm:$0xff]   ;;  %v3375_v20 = vld [vmem:[%s3972_s29 + $0x40] sm:$0xff]  }
 0xd16   : > { %v3145_v51 = vpop.f32.mrf.mxu0  ;;  %2979 = vmatpush3.bf16.msra.mxu0 %v3370_v32 }
 0xd17   : > { %v1912_v52 = vadd.f32 %v1908_v48, %v4033_v50  ;;  %2980 = vmatprep.subr.bf16.mxu0 %v3371_v46  ;;  %v3376_v48 = vld [vmem:[%s3972_s29] sm:$0xff]   ;;  %v1967_v51 = vsub.s32 2, %v4052_v56 }
 0xd19   : > { %1915 = vadd.xlane.f32.xlu0 %v1912_v52  ;;  %v1972_v53 = vrot.slane %v4055_v57, %v1967_v51 }
 0xd1a   : > { %2981 = vmatpush3.bf16.msra.mxu0 %v3372_v47 }
 0xd1b   : > { %2982 = vmatprep.subr.bf16.mxu0 %v3373_v33 }
 0xd9e   : > { %v1914_v4 = vpop.xlane.xlu1 %1913 }
 0xd9f   : > { %v1918_v55 = vmul.f32 0.0078125, %v1914_v4 }
 0xda1   : > { %v1920_v18 = vsub.f32 %v1911_v40, %v1918_v55  ;;  %v3374_v40 = vld [vmem:[%s3972_s29 + $0x8] sm:$0xff]  }
 0xda2   : > { %v1916_v49 = vpop.xlane.xlu0 %1915  ;;  %2983 = vmatpush3.bf16.msra.mxu0 %v3374_v40 }
 0xda3   : > { %v1919_v26 = vmul.f32 0.0078125, %v1916_v49  ;;  %v1922_v30 = vmul.f32 %v1920_v18, %v1920_v18  ;;  %2984 = vmatprep.subr.bf16.mxu0 %v3375_v20 }
 0xda5   : > { %v1921_v3 = vsub.f32 %v1912_v52, %v1919_v26  ;;  %1924 = vadd.xlane.f32.xlu0 %v1922_v30  ;;  %v1968_v52 = vrot.slane %v4059_v59, %v1967_v51 }
 0xda6   : > { %2985 = vmatpush3.bf16.msra.mxu0 %v3376_v48 }
 0xda7   : > { %v1923_v50 = vmul.f32 %v1921_v3, %v1921_v3 }
 0xda9   : > { %1926 = vadd.xlane.f32.xlu0 %v1923_v50 }
 0xe2e   : > { %v1925_v9 = vpop.xlane.xlu0 %1924 }
 0xe2f   : > { %v1928_v7 = vmul.f32 0.0078125, %v1925_v9 }
 0xe31   : > { %v1930_v10 = vadd.f32 1e-05, %v1928_v7 }
 0xe32   : > { %v1927_v11 = vpop.xlane.xlu0 %1926 }
 0xe33   : > { %3409 = vrsqrt.f32 %v1930_v10  ;;  %v1929_v12 = vmul.f32 0.0078125, %v1927_v11 }
 0xe35   : > { %v1931_v14 = vadd.f32 1e-05, %v1929_v12 }
 0xe37   : > { %3411 = vrsqrt.f32 %v1931_v14 }
 0xe40   : > { %v3410_v16 = vpop.eup %3409 }
 0xe41   : > { %v1934_v17 = vmul.f32 %v3410_v16, %v1920_v18 }
 0xe43   : > { %v1940_v25 = vmul.f32 %v1939_v21, %v1934_v17 }
 0xe44   : > { %v3412_v23 = vpop.eup %3411 }
 0xe45   : > { %v1935_v24 = vmul.f32 %v3412_v23, %v1921_v3  ;;  %v4287_v34 = vadd.f32 %v1945_v27, %v1940_v25 }
 0xe47   : > { %v1941_v31 = vmul.f32 %v1939_v21, %v1935_v24 }
 0xe49   : > { %v4289_v29 = vadd.f32 %v1945_v27, %v1941_v31 }
 0xe4b   : > { %v1948_v35 = vpack.c.bf16 %v4289_v29, %v4287_v34 }
 0xe4d   : > { %2086 = vmatmul.mubr.bf16.vlgmr.msra.gmra.mxu1 %v1948_v35 }
 0xf0d   : > { %v2087_v54 = vpop.f32.mrf.mxu1 }
 0xf0e   : > { %v4312_v4 = vadd.f32 %v2087_v54, %v1968_v52 }
 0xf0f   : > { %v2089_v55 = vpop.f32.mrf.mxu1 }
 0xf10   : > { %v4315_v18 = vmul.f32 0.70710677, %v4312_v4  ;;  %v4317_v49 = vadd.f32 %v2089_v55, %v1972_v53 }
 0xf11   : > { %v2091_v26 = vpop.f32.mrf.mxu1 }
 0xf12   : > { %v2112_v30 = vand.u32 2147483647, %v4315_v18  ;;  %v4321_v3 = vmul.f32 0.70710677, %v4317_v49  ;;  %v4323_v50 = vadd.f32 %v2091_v26, %v1968_v52  ;;  %vm2104_vm6 = vcmp.lt.f32.partialorder %v4315_v18, 0.0 }
 0xf13   : > { %v2093_v59 = vpop.f32.mrf.mxu1 }
 0xf14   : > { %v2116_v8 = vmul.f32 0.3275911, %v2112_v30  ;;  %v2113_v57 = vand.u32 2147483647, %v4321_v3  ;;  %v4327_v58 = vmul.f32 0.70710677, %v4323_v50  ;;  %v4329_v13 = vadd.f32 %v2093_v59, %v1972_v53 }
 0xf15   : > { %v2164_v28 = vsub.f32 0.0, %v2112_v30  ;;  %vm2105_vm7 = vcmp.lt.f32.partialorder %v4321_v3, 0.0 }
 0xf16   : > { %v2120_v60 = vadd.f32 1.0, %v2116_v8  ;;  %v2117_v61 = vmul.f32 0.3275911, %v2113_v57  ;;  %v2114_v19 = vand.u32 2147483647, %v4327_v58  ;;  %v2165_v9 = vsub.f32 0.0, %v2113_v57 }
 0xf17   : > { %v4333_v62 = vmul.f32 0.70710677, %v4329_v13  ;;  %v2168_v7 = vmul.f32 %v2164_v28, %v2112_v30  ;;  %vm2106_vm8 = vcmp.lt.f32.partialorder %v4327_v58, 0.0 }
 0xf18   : > { %3413 = vrcp.f32 %v2120_v60  ;;  %v2121_v63 = vadd.f32 1.0, %v2117_v61  ;;  %v2118_v0 = vmul.f32 0.3275911, %v2114_v19  ;;  %v2166_v10 = vsub.f32 0.0, %v2114_v19 }
 0xf19   : > { %v2115_v1 = vand.u32 2147483647, %v4333_v62  ;;  %v2169_v12 = vmul.f32 %v2165_v9, %v2113_v57  ;;  %v2172_v16 = vmul.f32 1.442695, %v2168_v7  ;;  %vm2107_vm9 = vcmp.lt.f32.partialorder %v4333_v62, 0.0 }
 0xf1a   : > { %3415 = vrcp.f32 %v2121_v63  ;;  %v2122_v2 = vadd.f32 1.0, %v2118_v0  ;;  %v2170_v17 = vmul.f32 %v2166_v10, %v2114_v19 }
 0xf1b   : > { %v2119_v5 = vmul.f32 0.3275911, %v2115_v1  ;;  %v2167_v15 = vsub.f32 0.0, %v2115_v1  ;;  %v2174_v24 = vmul.f32 1.442695, %v2169_v12 }
 0xf1c   : > { %3417 = vrcp.f32 %v2122_v2  ;;  %v2176_v37 = vmul.f32 1.442695, %v2170_v17 }
 0xf1d   : > { %v2123_v6 = vadd.f32 1.0, %v2119_v5  ;;  %v2171_v31 = vmul.f32 %v2167_v15, %v2115_v1 }
 0xf1f   : > { %3419 = vrcp.f32 %v2123_v6  ;;  %v2178_v45 = vmul.f32 1.442695, %v2171_v31 }
 0xf20   : > { %3421 = vpow2.f32 %v2172_v16  ;;  %v3680_v16 = vmov 1.0  }
 0xf21   : > { %3423 = vpow2.f32 %v2174_v24  ;;  %v2108_v17 = vsel %vm2104_vm6, -1.0, %v3680_v16  ;;  %v2110_v24 = vsel %vm2106_vm8, -1.0, %v3680_v16 }
 0xf22   : > { %3425 = vpow2.f32 %v2176_v37 }
 0xf23   : > { %3427 = vpow2.f32 %v2178_v45 }
 0xf25   : > { %v3414_v11 = vpop.eup %3413 }
 0xf26   : > { %v2128_v14 = vmul.f32 1.0614054, %v3414_v11 }
 0xf27   : > { %v3416_v21 = vpop.eup %3415 }
 0xf28   : > { %v2132_v22 = vadd.f32 -1.4531521, %v2128_v14  ;;  %v2129_v23 = vmul.f32 1.0614054, %v3416_v21 }
 0xf29   : > { %v3418_v25 = vpop.eup %3417 }
 0xf2a   : > { %v2136_v27 = vmul.f32 %v3414_v11, %v2132_v22  ;;  %v2133_v35 = vadd.f32 -1.4531521, %v2129_v23  ;;  %v2130_v36 = vmul.f32 1.0614054, %v3418_v25 }
 0xf2c   : > { %v2140_v38 = vadd.f32 1.4214138, %v2136_v27  ;;  %v3420_v39 = vpop.eup %3419  ;;  %v2137_v41 = vmul.f32 %v3416_v21, %v2133_v35  ;;  %v2134_v42 = vadd.f32 -1.4531521, %v2130_v36  ;;  %v2111_v35 = vsel %vm2107_vm9, -1.0, %v3680_v16 }
 0xf2d   : > { %v2131_v44 = vmul.f32 1.0614054, %v3420_v39  ;;  %v3422_v61 = vpop.eup %3421 }
 0xf2e   : > { %v2144_v43 = vmul.f32 %v3414_v11, %v2140_v38  ;;  %v2141_v32 = vadd.f32 1.4214138, %v2137_v41  ;;  %v2138_v46 = vmul.f32 %v3418_v25, %v2134_v42  ;;  %v3424_v2 = vpop.eup %3423  ;;  %v2098_v38 = vmul.f32 0.5, %v4323_v50 }
 0xf2f   : > { %v2135_v33 = vadd.f32 -1.4531521, %v2131_v44  ;;  %v3426_v9 = vpop.eup %3425  ;;  %v2099_v41 = vmul.f32 0.5, %v4329_v13 }
 0xf30   : > { %v2148_v47 = vadd.f32 -0.28449672, %v2144_v43  ;;  %v2145_v40 = vmul.f32 %v3416_v21, %v2141_v32  ;;  %v2142_v20 = vadd.f32 1.4214138, %v2138_v46  ;;  %v3428_v15 = vpop.eup %3427  ;;  %v2096_v43 = vmul.f32 0.5, %v4312_v4 }
 0xf31   : > { %v2139_v51 = vmul.f32 %v3420_v39, %v2135_v33  ;;  %v2236_v33 = vsub.s32 3, %v4052_v56 }
 0xf32   : > { %v2152_v48 = vmul.f32 %v3414_v11, %v2148_v47  ;;  %v2149_v52 = vadd.f32 -0.28449672, %v2145_v40  ;;  %v2146_v53 = vmul.f32 %v3418_v25, %v2142_v20  ;;  %v3433_v20 = vld [vmem:[%s3974_s13] sm:$0xff]  ;;  %s4451_s13 = sld [smem:[#allocation22_spill]] (!%p2894_p4) }
 0xf33   : > { %v2143_v55 = vadd.f32 1.4214138, %v2139_v51  ;;  %v2237_v50 = vrot.slane %v3433_v20, %v2236_v33 }
 0xf34   : > { %v2156_v54 = vadd.f32 0.2548296, %v2152_v48  ;;  %v2153_v26 = vmul.f32 %v3416_v21, %v2149_v52  ;;  %v2150_v30 = vadd.f32 -0.28449672, %v2146_v53 }
 0xf35   : > { %v2147_v8 = vmul.f32 %v3420_v39, %v2143_v55 }
 0xf36   : > { %v2160_v59 = vmul.f32 %v3414_v11, %v2156_v54  ;;  %v2157_v57 = vadd.f32 0.2548296, %v2153_v26  ;;  %v2154_v60 = vmul.f32 %v3418_v25, %v2150_v30 }
 0xf37   : > { %v2151_v19 = vadd.f32 -0.28449672, %v2147_v8 }
 0xf38   : > { %v2180_v63 = vmul.f32 %v3422_v61, %v2160_v59  ;;  %v2161_v0 = vmul.f32 %v3416_v21, %v2157_v57  ;;  %v2158_v1 = vadd.f32 0.2548296, %v2154_v60  ;;  %v2109_v21 = vsel %vm2105_vm7, -1.0, %v3680_v16 }
 0xf39   : > { %v2155_v5 = vmul.f32 %v3420_v39, %v2151_v19 }
 0xf3a   : > { %v2181_v6 = vmul.f32 %v3424_v2, %v2161_v0  ;;  %v2162_v28 = vmul.f32 %v3418_v25, %v2158_v1  ;;  %v2184_v10 = vsub.f32 1.0, %v2180_v63 }
 0xf3b   : > { %v2159_v7 = vadd.f32 0.2548296, %v2155_v5 }
 0xf3c   : > { %v2185_v11 = vsub.f32 1.0, %v2181_v6  ;;  %v2182_v12 = vmul.f32 %v3426_v9, %v2162_v28  ;;  %v2188_v18 = vmul.f32 %v2184_v10, %v2108_v17  ;;  %v2407_v6 = vsub.s32 7, %v4052_v56 }
 0xf3d   : > { %v2163_v14 = vmul.f32 %v3420_v39, %v2159_v7  ;;  %v2097_v39 = vmul.f32 0.5, %v4317_v49 }
 0xf3e   : > { %v2186_v22 = vsub.f32 1.0, %v2182_v12  ;;  %v2189_v23 = vmul.f32 %v2185_v11, %v2109_v21  ;;  %v2192_v58 = vadd.f32 1.0, %v2188_v18  ;;  %v2408_v7 = vrot.slane %v3433_v20, %v2407_v6 }
 0xf3f   : > { %v2183_v25 = vmul.f32 %v3428_v15, %v2163_v14 }
 0xf40   : > { %v2190_v27 = vmul.f32 %v2186_v22, %v2110_v24  ;;  %v2193_v36 = vadd.f32 1.0, %v2189_v23  ;;  %v2196_v32 = vmul.f32 %v2192_v58, %v2096_v43 }
 0xf41   : > { %v2187_v3 = vsub.f32 1.0, %v2183_v25 }
 0xf42   : > { %v2194_v31 = vadd.f32 1.0, %v2190_v27  ;;  %v2197_v44 = vmul.f32 %v2193_v36, %v2097_v39 }
 0xf43   : > { %v2191_v37 = vmul.f32 %v2187_v3, %v2111_v35 }
 0xf44   : > { %v2198_v62 = vmul.f32 %v2194_v31, %v2098_v38 }
 0xf45   : > { %v2195_v42 = vadd.f32 1.0, %v2191_v37 }
 0xf46   : > { %v2200_v47 = vpack.c.bf16 %v2198_v62, %v2196_v32 }
 0xf47   : > { %v2199_v45 = vmul.f32 %v2195_v42, %v2099_v41 }
 0xf49   : > { %v2201_v46 = vpack.c.bf16 %v2199_v45, %v2197_v44 }
 0xf4b   : > { %2366 = vmatprep.mubr.bf16.mxu0 %v2201_v46 }
 0xf4c   : > { %2367 = vmatmul.mubr.bf16.vlgmr.msra.gmra.mxu0 %v2200_v47 }
0x100c   : > { %v2986_v40 = vpop.f32.mrf.mxu0 }
0x100e   : > { %v2987_v48 = vpop.f32.mrf.mxu0 }
0x100f   : > { %v2988_v49 = vadd.f32 %v2987_v48, %v2986_v40 }
0x1010   : > { %v2989_v51 = vpop.f32.mrf.mxu0 }
0x1011   : > { %v2369_v13 = vadd.f32 %v2988_v49, %v2237_v50 }
0x1012   : > { %v2990_v52 = vpop.f32.mrf.mxu0 }
0x1013   : > { %v2991_v53 = vadd.f32 %v2990_v52, %v2989_v51  ;;  %v2375_v4 = vadd.f32 %v2369_v13, %v4287_v34 }
0x1015   : > { %v2372_v54 = vadd.f32 %v2991_v53, %v2237_v50  ;;  %2377 = vadd.xlane.f32.xlu1 %v2375_v4 }
0x1017   : > { %v2376_v55 = vadd.f32 %v2372_v54, %v4289_v29  ;;  %v2401_v29 = vsub.s32 6, %v4052_v56 }
0x1019   : > { %2379 = vadd.xlane.f32.xlu0 %v2376_v55  ;;  %v2402_v28 = vrot.slane %v3433_v20, %v2401_v29 }
0x109e   : > { %v2378_v26 = vpop.xlane.xlu1 %2377 }
0x109f   : > { %v2381_v30 = vmul.f32 0.0078125, %v2378_v26 }
0x10a1   : > { %v2383_v59 = vsub.f32 %v2375_v4, %v2381_v30 }
0x10a2   : > { %v2380_v8 = vpop.xlane.xlu0 %2379 }
0x10a3   : > { %v2382_v57 = vmul.f32 0.0078125, %v2380_v8  ;;  %v2385_v60 = vmul.f32 %v2383_v59, %v2383_v59 }
0x10a5   : > { %v2384_v61 = vsub.f32 %v2376_v55, %v2382_v57  ;;  %2387 = vadd.xlane.f32.xlu1 %v2385_v60 }
0x10a7   : > { %v2386_v19 = vmul.f32 %v2384_v61, %v2384_v61 }
0x10a9   : > { %2389 = vadd.xlane.f32.xlu0 %v2386_v19 }
0x112e   : > { %v2388_v63 = vpop.xlane.xlu1 %2387 }
0x112f   : > { %v2391_v0 = vmul.f32 0.0078125, %v2388_v63 }
0x1131   : > { %v2393_v1 = vadd.f32 1e-05, %v2391_v0 }
0x1132   : > { %v2390_v2 = vpop.xlane.xlu0 %2389 }
0x1133   : > { %3429 = vrsqrt.f32 %v2393_v1  ;;  %v2392_v34 = vmul.f32 0.0078125, %v2390_v2 }
0x1135   : > { %v2394_v5 = vadd.f32 1e-05, %v2392_v34 }
0x1137   : > { %3431 = vrsqrt.f32 %v2394_v5 }
0x1140   : > { %v3430_v9 = vpop.eup %3429 }
0x1141   : > { %v2397_v10 = vmul.f32 %v3430_v9, %v2383_v59 }
0x1143   : > { %v2403_v11 = vmul.f32 %v2402_v28, %v2397_v10 }
0x1144   : > { %v3432_v12 = vpop.eup %3431 }
0x1145   : > { %v2409_v14 = vadd.f32 %v2408_v7, %v2403_v11  ;;  %v2398_v15 = vmul.f32 %v3432_v12, %v2384_v61 }
0x1147   : > { %2411 = vst [vmem:[#allocation2] sm:$0xff] %v2409_v14  ;;  %v2404_v16 = vmul.f32 %v2402_v28, %v2398_v15  ;;  %2416 = sbr.rel (%p2894_p4) target bundleno = 4857 (0x12f9), region = 92 }
0x1149   : > { %v2410_v17 = vadd.f32 %v2408_v7, %v2404_v16 }
0x114b   : > { %2412 = vst [vmem:[#allocation2 + $0x8] sm:$0xff] %v2410_v17 }
0x114c   : > { %v3434_v21 = vld [vmem:[%s4451_s13 + $0x38] sm:$0xff]   ;;  %v3681_v56 = vmov 0.0   ;;  %v3435_v22 = vld [vmem:[%s4451_s13 + $0x30] sm:$0xff]   ;;  %vm3682_vm10 = vmmov 0   ;;  %v3436_v23 = vld [vmem:[%s4451_s13 + $0x28] sm:$0xff]   ;;  %v2418_v3 = vpack.c.bf16 %v2410_v17, %v2410_v17  ;;  %v2417_v36 = vpack.c.bf16 %v2409_v14, %v2409_v14 }
0x114d   : > { %3146 = vmatprep.subr.bf16.mxu0 %v3681_v56  ;;  %3166 = vmatprep.subr.bf16.mxu1 %v3681_v56  ;;  %v3442_v24 = vld [vmem:[#allocation11 + $0x38] sm:$0xff]   ;;  %v3437_v25 = vld [vmem:[%s4451_s13 + $0x20] sm:$0xff]   ;;  %v3443_v18 = vld [vmem:[#allocation11 + $0x30] sm:$0xff]   ;;  %vm2445_vm11 = vcmask 1041409  }
0x114e   : > { %3147 = vmatpush3.bf16.msra.mxu0 %v3434_v21  ;;  %3162 = vmatprep.mubr.msk.bf16.mxu0 %vm3682_vm10, %v3681_v56  ;;  %v3438_v27 = vld [vmem:[%s4451_s13 + $0x18] sm:$0xff]   ;;  %v3444_v31 = vld [vmem:[#allocation11 + $0x28] sm:$0xff]   ;;  %v3439_v35 = vld [vmem:[%s4451_s13 + $0x10] sm:$0xff]   ;;  %v2443_v37 = vunpack.c.l.b16 %v2418_v3  ;;  %v2442_v39 = vunpack.c.l.b16 %v2417_v36 }
0x114f   : > { %3148 = vmatprep.subr.bf16.mxu0 %v3681_v56  ;;  %3182 = vmatprep.mubr.msk.bf16.mxu1 %vm3682_vm10, %v3681_v56  ;;  %v3445_v58 = vld [vmem:[#allocation11 + $0x20] sm:$0xff]   ;;  %v3440_v38 = vld [vmem:[%s4451_s13 + $0x8] sm:$0xff]   ;;  %v3446_v42 = vld [vmem:[#allocation11 + $0x18] sm:$0xff]  }
0x1150   : > { %3167 = vmatpush3.bf16.msra.mxu1 %v3442_v24  ;;  %v2444_v41 = vrot.slane %v2443_v37, 7  ;;  %v3441_v43 = vld [vmem:[%s4451_s13] sm:$0xff]   ;;  %v3447_v44 = vld [vmem:[#allocation11 + $0x10] sm:$0xff]   ;;  %v3448_v32 = vld [vmem:[#allocation11 + $0x8] sm:$0xff]  }
0x1151   : > { %3168 = vmatprep.subr.bf16.mxu1 %v3681_v56  ;;  %v3449_v46 = vld [vmem:[#allocation11] sm:$0xff]  }
0x1152   : > { %3149 = vmatpush3.bf16.msra.mxu0 %v3435_v22  ;;  %v2446_v62 = vsel %vm2445_vm11, %v2444_v41, %v2442_v39  ;;  %v2895_v47 = vld [vmem:[%s4452_s22] ss:$0 sm:$0xff]  ;;  %v2904_v51 = vld [vmem:[%s4452_s22 + $0x1] ss:$0 sm:$0xff] }
0x1153   : > { %3150 = vmatprep.subr.bf16.mxu0 %v3681_v56  ;;  %v2447_v45 = vpack.c.b16 %v2446_v62, %v2446_v62 }
0x1154   : > { %3169 = vmatpush3.bf16.msra.mxu1 %v3443_v18 }
0x1155   : > { %3170 = vmatprep.subr.bf16.mxu1 %v3681_v56 }
0x1156   : > { %3151 = vmatpush3.bf16.msra.mxu0 %v3436_v23 }
0x1157   : > { %3152 = vmatprep.subr.bf16.mxu0 %v3681_v56 }
0x1158   : > { %3171 = vmatpush3.bf16.msra.mxu1 %v3444_v31 }
0x1159   : > { %3172 = vmatprep.subr.bf16.mxu1 %v3681_v56 }
0x115a   : > { %3153 = vmatpush3.bf16.msra.mxu0 %v3437_v25 }
0x115b   : > { %3154 = vmatprep.subr.bf16.mxu0 %v3681_v56 }
0x115c   : > { %3173 = vmatpush3.bf16.msra.mxu1 %v3445_v58 }
0x115d   : > { %3174 = vmatprep.subr.bf16.mxu1 %v3681_v56 }
0x115e   : > { %3155 = vmatpush3.bf16.msra.mxu0 %v3438_v27 }
0x115f   : > { %3156 = vmatprep.subr.bf16.mxu0 %v3681_v56 }
0x1160   : > { %3175 = vmatpush3.bf16.msra.mxu1 %v3446_v42 }
0x1161   : > { %3176 = vmatprep.subr.bf16.mxu1 %v3681_v56 }
0x1162   : > { %3157 = vmatpush3.bf16.msra.mxu0 %v3439_v35 }
0x1163   : > { %3158 = vmatprep.subr.bf16.mxu0 %v3681_v56 }
0x1164   : > { %3177 = vmatpush3.bf16.msra.mxu1 %v3447_v44 }
0x1165   : > { %3178 = vmatprep.subr.bf16.mxu1 %v3681_v56 }
0x1166   : > { %3159 = vmatpush3.bf16.msra.mxu0 %v3440_v38 }
0x1167   : > { %3160 = vmatprep.subr.bf16.mxu0 %v3681_v56 }
0x1168   : > { %3179 = vmatpush3.bf16.msra.mxu1 %v3448_v32 }
0x1169   : > { %3180 = vmatprep.subr.bf16.mxu1 %v3681_v56 }
0x116a   : > { %3161 = vmatpush3.bf16.msra.mxu0 %v3441_v43 }
0x116c   : > { %3181 = vmatpush3.bf16.msra.mxu1 %v3449_v46 }
0x116d   : > { %3163 = vmatmul.mubr.bf16.vlgmr.msra.gmra.mxu0 %v2447_v45 }
0x122d   : > { %v2531_v33 = vpop.f32.mrf.mxu0 }
0x122e   : > { %v2532_v40 = vadd.f32 %v2895_v47, %v2531_v33 }
0x122f   : > { %v3164_v20 = vpop.f32.mrf.mxu0 }
0x1230   : > { %v2537_v50 = vpack.c.bf16 %v2532_v40, %v2532_v40 }
0x1231   : > { %v2534_v48 = vpop.f32.mrf.mxu0 }
0x1232   : > { %3183 = vmatmul.mubr.bf16.vlgmr.msra.gmra.mxu1 %v2537_v50 }
0x1233   : > { %v3165_v49 = vpop.f32.mrf.mxu0 }
0x12f2   : > { %v2641_v13 = vpop.f32.mrf.mxu1 }
0x12f3   : > { %v2642_v52 = vadd.f32 %v2904_v51, %v2641_v13 }
0x12f4   : > { %v3184_v53 = vpop.f32.mrf.mxu1 }
0x12f5   : > { %2647 = vst [vmem:[#allocation12] sm:$0x3] %v2642_v52 }
0x12f6   : > { %v2644_v4 = vpop.f32.mrf.mxu1 }
0x12f8   : > { %v3185_v54 = vpop.f32.mrf.mxu1 }
0x12f9 PF: > { %p3228_p9 = scmp.eq.s32.totalorder %s3763_s21, 1  ;;  %s3683_s29 = smov [#allocation12]  }
0x12fa   : > { %s2655_s24 = sshll.u32 %s3683_s29, 4  ;;  %s2656_s24 = int_to_ptr.vmem [resolvable:$true] %s2655_s24 }
0x12fb   : > { %s3588_s19 = scalar_lea.vmem %s2656_s24, 32  ;;  %p3595_p13 = scmp.lt.s32.totalorder %s2656_s24, %s2656_s24 }
0x12fc   : > { %p3589_p8 = scmp.ne.s32.totalorder %s2656_s24, %s3588_s19  ;;  %p3596_p1 = scmp.lt.s32.totalorder %s3588_s19, %s3588_s19 }
0x12fe   : > { %p3590_p10 = pnand %p3589_p8, %p3228_p9  ;;  %p3597_p2 = por %p3596_p1, %p3595_p13 }
0x1300   : > { %p3591_p12 = pneg %p3590_p10 }
0x1302   : > { %p3598_p3 = pnand %p3597_p2, %p3591_p12 }
0x1304   : > { %3601 = shalt.err (!%p3598_p3)
}
0x1305   : > { %s4453_s20 = sld [smem:[#allocation24_spill]] }
0x130b   : > { %3205 = dma.vmem_to_hbm [thread:$0]  (%p3228_p9), %s2656_s24, 32, %s4453_s20, [#allocation5]  }
0x130c   : > { %3645 = dma.done.wait (%p3228_p9), [#allocation5], 32  }
0x130d   : > { %3647 = vsyncadd (%p3228_p9), [#allocation5], 4294967264 }
0x130e PF: > { %s4454_s20 = sld [smem:[#allocation19_spill]]  ;;  %s4457_s17 = smov %s3654_s18 }
0x130f   : > { %s4455_s27 = sld [smem:[#allocation18_spill]] }
0x1310   : > { %s4456_s19 = sld [smem:[#allocation20_spill]] }
0x1314   : > { %p28_p5 = scmp.ge.s32.totalorder %s4454_s20, 4  }
0x1315   : > { %s4458_s18 = smov %s4455_s27 }
0x1316   :  { %30 = sbr.rel (!%p28_p5) target bundleno = 13 (0xd), region = 153 }
0x131b   :  { %2668 = vsyncpa [#allocation4], 1 }
0x131c   :  { %2670 = vsyncpa [#allocation4 + $0x1], 1 }
0x131d   :  { %2671 = vsyncpa [#allocation7], 1 }
0x131e   :  { %2673 = vsyncpa [#allocation7 + $0x1], 1 }
0x131f   :  { %2674 = vsyncpa [#allocation10], 1 }
0x1320   :  { %2676 = vsyncpa [#allocation10 + $0x1], 1 }
0x1321   :  { %2677 = vsyncpa [#allocation5], 1 }
0x1322   :  { %2679 = vsyncpa [#allocation5 + $0x1], 1 }

</bundles_post_ra>
